<compile_context>
chip_gen: v7x
topology: tpu7x:2x2x1
jax: 0.10.0
libtpu: 0.0.40
codegen_flags: <defaults>
</compile_context>

<pallas_src>
import numpy as np
import jax
import jax.numpy as jnp
from jax import lax
from jax.experimental import pallas as pl
from jax.experimental.pallas import tpu as pltpu


def _round_up(n, m):
    return ((n + m - 1) // m) * m


# ----------------------------------------------------------------------------
# Pallas kernels
# ----------------------------------------------------------------------------

def make_rnn_verify_kernel(num_layers, n_verify, tc, nbb, hp):
    """Elman RNN (tanh) over one time chunk + fused verify-MLP epilogue.

    refs = [x, (wih, whh, b)*num_layers, (vw, vb)*n_verify,
            hidden_out, verify_out, h_scratch]
    """
    def kernel(*refs):
        x_ref = refs[0]
        rnn_refs = refs[1:1 + 3 * num_layers]
        v_refs = refs[1 + 3 * num_layers:1 + 3 * num_layers + 2 * n_verify]
        hid_ref = refs[1 + 3 * num_layers + 2 * n_verify]
        pol_ref = refs[2 + 3 * num_layers + 2 * n_verify]
        h_scr = refs[3 + 3 * num_layers + 2 * n_verify]

        # New batch-row chunk -> reset the carried hidden state.
        @pl.when(pl.program_id(1) == 0)
        def _():
            h_scr[...] = jnp.zeros_like(h_scr)

        f_in = x_ref.shape[-1]
        # Hoisted layer-0 input projection for the whole chunk:
        # one (tc*nbb, F) @ (F, Hp) GEMM instead of tc tiny per-step dots.
        x = x_ref[...].astype(jnp.float32).reshape(tc * nbb, f_in)
        wih0 = rnn_refs[0][...]
        b0 = rnn_refs[2][...]
        ih0 = (jnp.dot(x, wih0, preferred_element_type=jnp.float32) + b0
               ).reshape(tc, nbb, hp)

        # Recurrent weights read once per chunk.
        whh0 = rnn_refs[1][...]
        deep = [(rnn_refs[3 * l][...], rnn_refs[3 * l + 1][...],
                 rnn_refs[3 * l + 2][...]) for l in range(1, num_layers)]

        for t in range(tc):  # static unroll over the chunk
            h = jnp.tanh(ih0[t] + jnp.dot(h_scr[0], whh0,
                                          preferred_element_type=jnp.float32))
            h_scr[0] = h
            inp = h
            for l, (wih, whh, b) in enumerate(deep, start=1):
                h = jnp.tanh(
                    jnp.dot(inp, wih, preferred_element_type=jnp.float32)
                    + jnp.dot(h_scr[l], whh, preferred_element_type=jnp.float32)
                    + b)
                h_scr[l] = h
                inp = h
            hid_ref[t] = inp  # lane-dense (nbb, Hp) store

        # Fused verify head on the whole chunk (avoids an HBM round trip).
        v = hid_ref[...].reshape(tc * nbb, hp)
        for j in range(n_verify):
            vw = v_refs[2 * j][...]
            vb = v_refs[2 * j + 1][...]
            v = jnp.dot(v, vw, preferred_element_type=jnp.float32) + vb
            if j < n_verify - 1:
                v = jnp.maximum(v, 0.0)
        pol_ref[...] = v.reshape(tc, nbb, -1)

    return kernel


def rnn_verify_pallas(x_tm, rnn_params_pad, verify_params_pad):
    """x_tm: [T, NB, F] time-major. Returns padded (hidden [T_pad, NB_pad, Hp],
    verify [T_pad, NB_pad, OUTVp]); caller slices off the padding."""
    T, NB, F = x_tm.shape
    L = len(rnn_params_pad)
    nV = len(verify_params_pad)
    Hp = rnn_params_pad[0][1].shape[0]
    OUTVp = verify_params_pad[-1][0].shape[1]

    NB_pad = _round_up(NB, 8)
    # Split rows over a leading "parallel" grid axis when big enough (v7x
    # megacore); per-chunk rows stay a multiple of 8 sublanes.
    nbb = NB_pad // 2 if (NB_pad % 16 == 0) else NB_pad
    nb_chunks = NB_pad // nbb

    tc = T if T <= 32 else 16
    T_pad = pl.cdiv(T, tc) * tc
    n_tc = T_pad // tc

    x = jnp.pad(x_tm.astype(jnp.float32),
                ((0, T_pad - T), (0, NB_pad - NB), (0, 0)))

    const = lambda n, c: (0, 0)
    in_specs = [pl.BlockSpec((tc, nbb, F), lambda n, c: (c, n, 0))]
    flat = []
    for (wih, whh, b) in rnn_params_pad:
        in_specs += [pl.BlockSpec(wih.shape, const),
                     pl.BlockSpec(whh.shape, const),
                     pl.BlockSpec(b.shape, const)]
        flat += [wih, whh, b]
    for (vw, vb) in verify_params_pad:
        in_specs += [pl.BlockSpec(vw.shape, const), pl.BlockSpec(vb.shape, const)]
        flat += [vw, vb]
    # TODO(synk): constant weight blocks are still double-buffered by default;
    # at much larger H consider pipeline_mode=pl.Buffered(1) or a one-shot copy.

    hidden, verify = pl.pallas_call(
        make_rnn_verify_kernel(L, nV, tc, nbb, Hp),
        out_shape=(jax.ShapeDtypeStruct((T_pad, NB_pad, Hp), jnp.float32),
                   jax.ShapeDtypeStruct((T_pad, NB_pad, OUTVp), jnp.float32)),
        grid=(nb_chunks, n_tc),
        in_specs=in_specs,
        out_specs=(pl.BlockSpec((tc, nbb, Hp), lambda n, c: (c, n, 0)),
                   pl.BlockSpec((tc, nbb, OUTVp), lambda n, c: (c, n, 0))),
        scratch_shapes=[pltpu.VMEM((L, nbb, Hp), jnp.float32)],
        compiler_params=pltpu.CompilerParams(
            dimension_semantics=("parallel", "arbitrary"),
            vmem_limit_bytes=32 * 1024 * 1024),
    )(x, *flat)
    return hidden, verify


def make_heads_kernel(head_n_layers):
    """Several MLP heads on the same input; final layers are pre-padded into
    disjoint columns of one shared lane-dense output slab, so head results can
    simply be summed."""
    def kernel(*refs):
        x_ref = refs[0]
        out_ref = refs[-1]
        x = x_ref[...].astype(jnp.float32)
        acc = None
        idx = 1
        for n_lin in head_n_layers:
            h = x
            for l in range(n_lin):
                w = refs[idx][...]
                b = refs[idx + 1][...]
                idx += 2
                h = jnp.dot(h, w, preferred_element_type=jnp.float32) + b
                if l < n_lin - 1:
                    h = jnp.maximum(h, 0.0)
            acc = h if acc is None else acc + h
        out_ref[...] = acc
    return kernel


def heads_pallas(x, heads_params, out_width, tile_r=512):
    """x: [rows, feat]. heads_params: list of per-head [(W, b), ...] whose final
    layers are already padded to `out_width` columns. Row-tiled over a parallel
    grid. Returns [rows, out_width]."""
    rows, feat = x.shape
    tr = min(tile_r, _round_up(rows, 8))
    r_pad = pl.cdiv(rows, tr) * tr
    x_pad = jnp.pad(x.astype(jnp.float32), ((0, r_pad - rows), (0, 0)))

    const = lambda i: (0, 0)
    in_specs = [pl.BlockSpec((tr, feat), lambda i: (i, 0))]
    flat = []
    for head in heads_params:
        for (w, b) in head:
            in_specs += [pl.BlockSpec(w.shape, const), pl.BlockSpec(b.shape, const)]
            flat += [w, b]

    out = pl.pallas_call(
        make_heads_kernel(tuple(len(h) for h in heads_params)),
        out_shape=jax.ShapeDtypeStruct((r_pad, out_width), jnp.float32),
        grid=(r_pad // tr,),
        in_specs=in_specs,
        out_specs=pl.BlockSpec((tr, out_width), lambda i: (i, 0)),
        compiler_params=pltpu.CompilerParams(
            dimension_semantics=("parallel",),
            vmem_limit_bytes=32 * 1024 * 1024),
    )(x_pad, *flat)
    return out[:rows]


# ----------------------------------------------------------------------------
# Pure-JAX references (for correctness check)
# ----------------------------------------------------------------------------

def rnn_ref(x_tm, rnn_params):
    T, NB, F = x_tm.shape
    num_layers = len(rnn_params)
    H = rnn_params[0][1].shape[0]
    h0 = jnp.zeros((num_layers, NB, H), jnp.float32)

    def step(h, x):
        new_h = []
        inp = x
        for l, (wih, whh, b) in enumerate(rnn_params):
            hl = jnp.tanh(inp @ wih + h[l] @ whh + b)
            new_h.append(hl)
            inp = hl
        return jnp.stack(new_h), inp

    _, ys = lax.scan(step, h0, x_tm)
    return ys


def mlp_ref(x, mlp_params):
    h = x
    for l, (w, b) in enumerate(mlp_params):
        h = h @ w + b
        if l < len(mlp_params) - 1:
            h = jnp.maximum(h, 0.0)
    return h


# ----------------------------------------------------------------------------
# Parameter padding helpers
# ----------------------------------------------------------------------------

def _pad_mlp_params(params, first_in_pad, first_row_map=None,
                    final_width=None, final_col_off=0):
    """Zero-pad an MLP ((W, b), W stored as (in, out)) so every activation
    width is a multiple of 128 lanes. `first_row_map` = [(src, dst, length)]
    scatters the first layer's input rows (used for the lane-padded agents
    layout). Zero padding is exact: ReLU(0)=0 and padded biases are 0."""
    n = len(params)
    padded = []
    in_pad = first_in_pad
    for i, (w, b) in enumerate(params):
        fin, fout = w.shape
        if i == n - 1 and final_width is not None:
            out_pad, col_off = final_width, final_col_off
        else:
            out_pad, col_off = _round_up(fout, 128), 0
        wp = jnp.zeros((in_pad, out_pad), jnp.float32)
        if i == 0 and first_row_map is not None:
            for (src, dst, length) in first_row_map:
                wp = wp.at[dst:dst + length, col_off:col_off + fout].set(
                    w[src:src + length])
        else:
            wp = wp.at[:fin, col_off:col_off + fout].set(w)
        bp = jnp.zeros((1, out_pad), jnp.float32).at[:, col_off:col_off + fout].set(b)
        padded.append((wp, bp))
        in_pad = out_pad
    return padded


def _init_linear(key, fan_in, fan_out):
    k1, k2 = jax.random.split(key)
    bound = 1.0 / np.sqrt(fan_in)
    w = jax.random.uniform(k1, (fan_in, fan_out), jnp.float32, -bound, bound)  # W^T
    b = jax.random.uniform(k2, (1, fan_out), jnp.float32, -bound, bound)
    return w, b


# ----------------------------------------------------------------------------
# AFPPNN model (parameter container + forward glue)
# ----------------------------------------------------------------------------

class AFPPNNPallas:
    def __init__(self, hidden_size, num_layers, pulse_layers_size, verify_layers_size,
                 critic_layer_size, input_common_size, input_per_level_size,
                 n_targets, targets_range, output_common_size, output_per_level_size,
                 seed=42):
        self.n_targets = n_targets
        self.targets_range = targets_range
        self.common_obser = input_common_size
        self.obser_per_level = input_per_level_size + 1
        self.hidden_size = hidden_size
        self.num_layers = num_layers
        self.output_common_size = output_common_size
        self.output_per_level_size = output_per_level_size

        H = hidden_size
        Hp = _round_up(H, 128)
        self.Hp = Hp
        self.head_slab = 128                       # shared pulse+critic output slab
        assert output_common_size + 1 <= self.head_slab

        key = jax.random.PRNGKey(seed)
        rnn_in = self.common_obser + self.obser_per_level

        # ---- raw (unpadded) parameters: per layer (W_ih^T, W_hh^T, b_ih+b_hh)
        self.rnn_params = []
        for l in range(num_layers):
            key, k1, k2, k3 = jax.random.split(key, 4)
            fan_in = rnn_in if l == 0 else hidden_size
            bound = 1.0 / np.sqrt(hidden_size)
            wih = jax.random.uniform(k1, (fan_in, hidden_size), jnp.float32, -bound, bound)
            whh = jax.random.uniform(k2, (hidden_size, hidden_size), jnp.float32, -bound, bound)
            b = jax.random.uniform(k3, (1, hidden_size), jnp.float32, -bound, bound)
            self.rnn_params.append((wih, whh, b))

        def build_mlp(sizes, out_dim):
            nonlocal key
            params = []
            dims = list(sizes) + [out_dim]
            for i in range(1, len(dims)):
                key, kk = jax.random.split(key)
                params.append(_init_linear(kk, dims[i - 1], dims[i]))
            return params

        self.pulse_params = build_mlp([hidden_size * n_targets] + list(pulse_layers_size),
                                      output_common_size)
        self.verify_params = build_mlp([hidden_size] + list(verify_layers_size),
                                       output_per_level_size)
        self.critic_params = build_mlp([hidden_size * n_targets] + list(critic_layer_size), 1)

        # ---- lane/sublane-padded parameters for the Pallas kernels ----------
        # RNN: hidden padded to Hp. Padded hidden columns stay exactly 0
        # (zero weights/bias, tanh(0)=0).
        self.rnn_params_pad = []
        for l, (wih, whh, b) in enumerate(self.rnn_params):
            fin = wih.shape[0]
            in_pad = fin if l == 0 else Hp
            wih_p = jnp.zeros((in_pad, Hp), jnp.float32).at[:fin, :H].set(wih)
            whh_p = jnp.zeros((Hp, Hp), jnp.float32).at[:H, :H].set(whh)
            b_p = jnp.zeros((1, Hp), jnp.float32).at[:, :H].set(b)
            self.rnn_params_pad.append((wih_p, whh_p, b_p))

        # Verify head consumes the padded RNN hidden state directly.
        self.verify_params_pad = _pad_mlp_params(
            self.verify_params, first_in_pad=Hp,
            final_width=_round_up(output_per_level_size, 128))

        # Pulse + critic consume the (B*T, n_targets*Hp) padded agents tensor;
        # final layers write disjoint columns of the shared 128-wide slab.
        row_map = [(i * H, i * Hp, H) for i in range(n_targets)]
        self.pulse_params_pad = _pad_mlp_params(
            self.pulse_params, first_in_pad=n_targets * Hp, first_row_map=row_map,
            final_width=self.head_slab, final_col_off=0)
        self.critic_params_pad = _pad_mlp_params(
            self.critic_params, first_in_pad=n_targets * Hp, first_row_map=row_map,
            final_width=self.head_slab, final_col_off=output_common_size)

    # TODO(synk): single_step / persistent hidden_state inference path not implemented.
    def forward(self, in_data_common, in_data_per_level, targets, critic=True,
                use_pallas=True):
        NT, H, Hp = self.n_targets, self.hidden_size, self.Hp
        t_norm = (targets - self.targets_range / 2.0) / self.targets_range
        B, T, _ = in_data_common.shape
        NB = NT * B
        outv = self.output_per_level_size
        oc = self.output_common_size

        # Build the RNN input directly time-major: [T, NT*B, F] with row i*B+b.
        common_tm = jnp.transpose(in_data_common, (1, 0, 2)).astype(jnp.float32)
        per_level_tm = jnp.transpose(in_data_per_level, (1, 0, 2, 3)).astype(jnp.float32)
        ones_tm = jnp.ones((T, B, 1), jnp.float32)
        blocks = [jnp.concatenate(
            [common_tm, t_norm[i] * ones_tm, per_level_tm[:, :, i]], axis=-1)
            for i in range(NT)]
        x_tm = jnp.concatenate(blocks, axis=1)                       # [T, NT*B, F]

        if use_pallas:
            hidden_pad, verify_pad = rnn_verify_pallas(
                x_tm, self.rnn_params_pad, self.verify_params_pad)
            policy = verify_pad[:T, :NB, :outv].reshape(T, NT, B, outv)
            policy = jnp.transpose(policy, (1, 2, 0, 3))             # [NT, B, T, outv]

            hid = hidden_pad[:T, :NB, :]                             # [T, NB, Hp] (keep padding)
            agents = jnp.transpose(hid.reshape(T, NT, B, Hp),
                                   (2, 0, 1, 3)).reshape(B * T, NT * Hp)
            heads = [self.pulse_params_pad] + ([self.critic_params_pad] if critic else [])
            head_out = heads_pallas(agents, heads, self.head_slab)   # [B*T, 128]
            pulse_common = head_out[:, :oc].reshape(B, T, oc)
            critic_out = head_out[:, oc:oc + 1].reshape(B, T, 1) if critic else None
        else:
            out_tm = rnn_ref(x_tm, self.rnn_params)                  # [T, NB, H]
            pol = mlp_ref(out_tm.reshape(T * NB, H), self.verify_params)
            policy = jnp.transpose(pol.reshape(T, NT, B, outv), (1, 2, 0, 3))
            agents = jnp.transpose(out_tm.reshape(T, NT, B, H),
                                   (2, 0, 1, 3)).reshape(B * T, NT * H)
            pulse_common = mlp_ref(agents, self.pulse_params).reshape(B, T, -1)
            critic_out = (mlp_ref(agents, self.critic_params).reshape(B, T, 1)
                          if critic else None)

        pulse_policy = jnp.concatenate(
            [pulse_common] + [policy[i, :, :, :2] for i in range(NT)], axis=-1)
        if policy.shape[-1] > 2:
            reading_policy = jnp.concatenate(
                [policy[i, :, :, 2:] for i in range(NT)], axis=-1)
            full_policy = jnp.concatenate([pulse_policy, reading_policy], axis=-1)
        else:
            full_policy = pulse_policy
        return full_policy, critic_out


# ----------------------------------------------------------------------------
# Main
# ----------------------------------------------------------------------------

if __name__ == "__main__":
    hidden_size = 32
    num_layers = 2
    n_targets = 2
    input_common_size = 4
    input_per_level_size = 2
    targets_range = 10.0
    output_common_size = 2        # forward assigns pulse head into [..., :2]
    output_per_level_size = 4     # policy[..., 2:] fills 2-wide reading slots

    model = AFPPNNPallas(
        hidden_size=hidden_size, num_layers=num_layers,
        pulse_layers_size=[32], verify_layers_size=[32], critic_layer_size=[32],
        input_common_size=input_common_size, input_per_level_size=input_per_level_size,
        n_targets=n_targets, targets_range=targets_range,
        output_common_size=output_common_size, output_per_level_size=output_per_level_size,
        seed=42)

    B, T = 2, 8
    key = jax.random.PRNGKey(0)
    k1, k2 = jax.random.split(key)
    in_data_common = jax.random.normal(k1, (B, T, input_common_size), jnp.float32)
    in_data_per_level = jax.random.normal(k2, (B, T, n_targets, input_per_level_size),
                                          jnp.float32)
    targets = jnp.array([2.0, 7.0], jnp.float32)

    policy, critic_val = model.forward(in_data_common, in_data_per_level, targets,
                                       critic=True, use_pallas=True)
    policy = jax.block_until_ready(policy)
    critic_val = jax.block_until_ready(critic_val)

    policy_ref, critic_ref = model.forward(in_data_common, in_data_per_level, targets,
                                           critic=True, use_pallas=False)
    assert policy.shape == (B, T, 2 * (n_targets + 1) + 2 * n_targets)
    assert critic_val.shape == (B, T, 1)
    assert np.allclose(np.asarray(policy), np.asarray(policy_ref), atol=2e-3, rtol=2e-3)
    assert np.allclose(np.asarray(critic_val), np.asarray(critic_ref), atol=2e-3, rtol=2e-3)

    print("KERNEL_OK")
</pallas_src>

<mosaic_0001>
module attributes {stable_mosaic.version = 11 : i64} {
  func.func @kernel(%arg0: i32, %arg1: i32, %arg2: memref<8x8x7xf32, #tpu.memory_space<vmem>>, %arg3: memref<7x128xf32, #tpu.memory_space<vmem>>, %arg4: memref<128x128xf32, #tpu.memory_space<vmem>>, %arg5: memref<1x128xf32, #tpu.memory_space<vmem>>, %arg6: memref<128x128xf32, #tpu.memory_space<vmem>>, %arg7: memref<128x128xf32, #tpu.memory_space<vmem>>, %arg8: memref<1x128xf32, #tpu.memory_space<vmem>>, %arg9: memref<128x128xf32, #tpu.memory_space<vmem>>, %arg10: memref<1x128xf32, #tpu.memory_space<vmem>>, %arg11: memref<128x128xf32, #tpu.memory_space<vmem>>, %arg12: memref<1x128xf32, #tpu.memory_space<vmem>>, %arg13: memref<8x8x128xf32, #tpu.memory_space<vmem>>, %arg14: memref<8x8x128xf32, #tpu.memory_space<vmem>>, %arg15: memref<2x8x128xf32, #tpu.memory_space<vmem>>) attributes {dimension_semantics = [#tpu.dimension_semantics<parallel>, #tpu.dimension_semantics<arbitrary>], iteration_bounds = array<i64: 1, 1>, scalar_prefetch = 0 : i64, scratch_operands = 1 : i64, tpu.core_type = #tpu.core_type<tc>, window_params = [{transform_indices = @transform_0, window_bounds = array<i64: 8, 8, 7>}, {pipeline_mode = #tpu.pipeline_mode<synchronous>, transform_indices = @transform_1, window_bounds = array<i64: 7, 128>}, {pipeline_mode = #tpu.pipeline_mode<synchronous>, transform_indices = @transform_2, window_bounds = array<i64: 128, 128>}, {pipeline_mode = #tpu.pipeline_mode<synchronous>, transform_indices = @transform_3, window_bounds = array<i64: 1, 128>}, {pipeline_mode = #tpu.pipeline_mode<synchronous>, transform_indices = @transform_4, window_bounds = array<i64: 128, 128>}, {pipeline_mode = #tpu.pipeline_mode<synchronous>, transform_indices = @transform_5, window_bounds = array<i64: 128, 128>}, {pipeline_mode = #tpu.pipeline_mode<synchronous>, transform_indices = @transform_6, window_bounds = array<i64: 1, 128>}, {pipeline_mode = #tpu.pipeline_mode<synchronous>, transform_indices = @transform_7, window_bounds = array<i64: 128, 128>}, {pipeline_mode = #tpu.pipeline_mode<synchronous>, transform_indices = @transform_8, window_bounds = array<i64: 1, 128>}, {pipeline_mode = #tpu.pipeline_mode<synchronous>, transform_indices = @transform_9, window_bounds = array<i64: 128, 128>}, {pipeline_mode = #tpu.pipeline_mode<synchronous>, transform_indices = @transform_10, window_bounds = array<i64: 1, 128>}, {transform_indices = @transform_11, window_bounds = array<i64: 8, 8, 128>}, {transform_indices = @transform_12, window_bounds = array<i64: 8, 8, 128>}]} {
    %c0_i32 = arith.constant 0 : i32
    %0 = arith.cmpi eq, %arg1, %c0_i32 : i32
    %1 = arith.extui %0 : i1 to i32
    %c0_i32_0 = arith.constant 0 : i32
    %2 = arith.cmpi ne, %1, %c0_i32_0 : i32
    scf.if %2 {
      %cst_169 = arith.constant 0.000000e+00 : f32
      %223 = vector.broadcast %cst_169 : f32 to vector<2x8x128xf32>
      %c0_170 = arith.constant 0 : index
      %c0_171 = arith.constant 0 : index
      %c0_172 = arith.constant 0 : index
      %224 = vector.load %arg15[%c0_170, %c0_171, %c0_172] : memref<2x8x128xf32, #tpu.memory_space<vmem>>, vector<2x8x128xf32>
      tpu.vector_store %arg15[%c0_170, %c0_171, %c0_172], %223 {strides = array<i32>} : memref<2x8x128xf32, #tpu.memory_space<vmem>>, vector<2x8x128xf32>,
    } else {
    }
    %c0 = arith.constant 0 : index
    %c0_1 = arith.constant 0 : index
    %c0_2 = arith.constant 0 : index
    %3 = vector.load %arg2[%c0, %c0_1, %c0_2] : memref<8x8x7xf32, #tpu.memory_space<vmem>>, vector<8x8x7xf32>
    %4 = vector.shape_cast %3 : vector<8x8x7xf32> to vector<64x7xf32>
    %c0_3 = arith.constant 0 : index
    %c0_4 = arith.constant 0 : index
    %5 = vector.load %arg3[%c0_3, %c0_4] : memref<7x128xf32, #tpu.memory_space<vmem>>, vector<7x128xf32>
    %c0_5 = arith.constant 0 : index
    %c0_6 = arith.constant 0 : index
    %6 = vector.load %arg5[%c0_5, %c0_6] : memref<1x128xf32, #tpu.memory_space<vmem>>, vector<1x128xf32>
    %cst = arith.constant dense<0.000000e+00> : vector<64x128xf32>
    %7 = tpu.matmul %4, %5, %cst {dimension_numbers = #tpu.dot_dimension_numbers<[1], [0], [0], [1], [0, 0, 1, 1], [], []>} : vector<64x7xf32>, vector<7x128xf32>, vector<64x128xf32> -> vector<64x128xf32>
    %8 = vector.broadcast %6 : vector<1x128xf32> to vector<64x128xf32>
    %9 = arith.addf %7, %8 : vector<64x128xf32>
    %10 = vector.shape_cast %9 : vector<64x128xf32> to vector<8x8x128xf32>
    %c0_7 = arith.constant 0 : index
    %c0_8 = arith.constant 0 : index
    %11 = vector.load %arg4[%c0_7, %c0_8] : memref<128x128xf32, #tpu.memory_space<vmem>>, vector<128x128xf32>
    %c0_9 = arith.constant 0 : index
    %c0_10 = arith.constant 0 : index
    %12 = vector.load %arg6[%c0_9, %c0_10] : memref<128x128xf32, #tpu.memory_space<vmem>>, vector<128x128xf32>
    %c0_11 = arith.constant 0 : index
    %c0_12 = arith.constant 0 : index
    %13 = vector.load %arg7[%c0_11, %c0_12] : memref<128x128xf32, #tpu.memory_space<vmem>>, vector<128x128xf32>
    %c0_13 = arith.constant 0 : index
    %c0_14 = arith.constant 0 : index
    %14 = vector.load %arg8[%c0_13, %c0_14] : memref<1x128xf32, #tpu.memory_space<vmem>>, vector<1x128xf32>
    %15 = vector.extract_strided_slice %10 {offsets = [0, 0, 0], sizes = [1, 8, 128], strides = [1, 1, 1]} : vector<8x8x128xf32> to vector<1x8x128xf32>
    %16 = vector.shape_cast %15 : vector<1x8x128xf32> to vector<8x128xf32>
    %c0_15 = arith.constant 0 : index
    %c0_16 = arith.constant 0 : index
    %c0_17 = arith.constant 0 : index
    %17 = vector.load %arg15[%c0_15, %c0_16, %c0_17] : memref<2x8x128xf32, #tpu.memory_space<vmem>>, vector<1x8x128xf32>
    %18 = vector.shape_cast %17 : vector<1x8x128xf32> to vector<8x128xf32>
    %cst_18 = arith.constant dense<0.000000e+00> : vector<8x128xf32>
    %19 = tpu.matmul %18, %11, %cst_18 {dimension_numbers = #tpu.dot_dimension_numbers<[1], [0], [0], [1], [0, 0, 1, 1], [], []>} : vector<8x128xf32>, vector<128x128xf32>, vector<8x128xf32> -> vector<8x128xf32>
    %20 = arith.addf %16, %19 : vector<8x128xf32>
    %21 = math.tanh %20 : vector<8x128xf32>
    %c0_19 = arith.constant 0 : index
    %c0_20 = arith.constant 0 : index
    %c0_21 = arith.constant 0 : index
    %22 = vector.load %arg15[%c0_19, %c0_20, %c0_21] : memref<2x8x128xf32, #tpu.memory_space<vmem>>, vector<1x8x128xf32>
    %23 = vector.shape_cast %22 : vector<1x8x128xf32> to vector<8x128xf32>
    %24 = vector.shape_cast %21 : vector<8x128xf32> to vector<1x8x128xf32>
    tpu.vector_store %arg15[%c0_19, %c0_20, %c0_21], %24 {strides = array<i32>} : memref<2x8x128xf32, #tpu.memory_space<vmem>>, vector<1x8x128xf32>,
    %cst_22 = arith.constant dense<0.000000e+00> : vector<8x128xf32>
    %25 = tpu.matmul %21, %12, %cst_22 {dimension_numbers = #tpu.dot_dimension_numbers<[1], [0], [0], [1], [0, 0, 1, 1], [], []>} : vector<8x128xf32>, vector<128x128xf32>, vector<8x128xf32> -> vector<8x128xf32>
    %c1 = arith.constant 1 : index
    %c0_23 = arith.constant 0 : index
    %c0_24 = arith.constant 0 : index
    %26 = vector.load %arg15[%c1, %c0_23, %c0_24] : memref<2x8x128xf32, #tpu.memory_space<vmem>>, vector<1x8x128xf32>
    %27 = vector.shape_cast %26 : vector<1x8x128xf32> to vector<8x128xf32>
    %cst_25 = arith.constant dense<0.000000e+00> : vector<8x128xf32>
    %28 = tpu.matmul %27, %13, %cst_25 {dimension_numbers = #tpu.dot_dimension_numbers<[1], [0], [0], [1], [0, 0, 1, 1], [], []>} : vector<8x128xf32>, vector<128x128xf32>, vector<8x128xf32> -> vector<8x128xf32>
    %29 = arith.addf %25, %28 : vector<8x128xf32>
    %30 = vector.broadcast %14 : vector<1x128xf32> to vector<8x128xf32>
    %31 = arith.addf %29, %30 : vector<8x128xf32>
    %32 = math.tanh %31 : vector<8x128xf32>
    %c1_26 = arith.constant 1 : index
    %c0_27 = arith.constant 0 : index
    %c0_28 = arith.constant 0 : index
    %33 = vector.load %arg15[%c1_26, %c0_27, %c0_28] : memref<2x8x128xf32, #tpu.memory_space<vmem>>, vector<1x8x128xf32>
    %34 = vector.shape_cast %33 : vector<1x8x128xf32> to vector<8x128xf32>
    %35 = vector.shape_cast %32 : vector<8x128xf32> to vector<1x8x128xf32>
    tpu.vector_store %arg15[%c1_26, %c0_27, %c0_28], %35 {strides = array<i32>} : memref<2x8x128xf32, #tpu.memory_space<vmem>>, vector<1x8x128xf32>,
    %c0_29 = arith.constant 0 : index
    %c0_30 = arith.constant 0 : index
    %c0_31 = arith.constant 0 : index
    %36 = vector.load %arg13[%c0_29, %c0_30, %c0_31] : memref<8x8x128xf32, #tpu.memory_space<vmem>>, vector<1x8x128xf32>
    %37 = vector.shape_cast %36 : vector<1x8x128xf32> to vector<8x128xf32>
    %38 = vector.shape_cast %32 : vector<8x128xf32> to vector<1x8x128xf32>
    tpu.vector_store %arg13[%c0_29, %c0_30, %c0_31], %38 {strides = array<i32>} : memref<8x8x128xf32, #tpu.memory_space<vmem>>, vector<1x8x128xf32>,
    %39 = vector.extract_strided_slice %10 {offsets = [1, 0, 0], sizes = [1, 8, 128], strides = [1, 1, 1]} : vector<8x8x128xf32> to vector<1x8x128xf32>
    %40 = vector.shape_cast %39 : vector<1x8x128xf32> to vector<8x128xf32>
    %c0_32 = arith.constant 0 : index
    %c0_33 = arith.constant 0 : index
    %c0_34 = arith.constant 0 : index
    %41 = vector.load %arg15[%c0_32, %c0_33, %c0_34] : memref<2x8x128xf32, #tpu.memory_space<vmem>>, vector<1x8x128xf32>
    %42 = vector.shape_cast %41 : vector<1x8x128xf32> to vector<8x128xf32>
    %cst_35 = arith.constant dense<0.000000e+00> : vector<8x128xf32>
    %43 = tpu.matmul %42, %11, %cst_35 {dimension_numbers = #tpu.dot_dimension_numbers<[1], [0], [0], [1], [0, 0, 1, 1], [], []>} : vector<8x128xf32>, vector<128x128xf32>, vector<8x128xf32> -> vector<8x128xf32>
    %44 = arith.addf %40, %43 : vector<8x128xf32>
    %45 = math.tanh %44 : vector<8x128xf32>
    %c0_36 = arith.constant 0 : index
    %c0_37 = arith.constant 0 : index
    %c0_38 = arith.constant 0 : index
    %46 = vector.load %arg15[%c0_36, %c0_37, %c0_38] : memref<2x8x128xf32, #tpu.memory_space<vmem>>, vector<1x8x128xf32>
    %47 = vector.shape_cast %46 : vector<1x8x128xf32> to vector<8x128xf32>
    %48 = vector.shape_cast %45 : vector<8x128xf32> to vector<1x8x128xf32>
    tpu.vector_store %arg15[%c0_36, %c0_37, %c0_38], %48 {strides = array<i32>} : memref<2x8x128xf32, #tpu.memory_space<vmem>>, vector<1x8x128xf32>,
    %cst_39 = arith.constant dense<0.000000e+00> : vector<8x128xf32>
    %49 = tpu.matmul %45, %12, %cst_39 {dimension_numbers = #tpu.dot_dimension_numbers<[1], [0], [0], [1], [0, 0, 1, 1], [], []>} : vector<8x128xf32>, vector<128x128xf32>, vector<8x128xf32> -> vector<8x128xf32>
    %c1_40 = arith.constant 1 : index
    %c0_41 = arith.constant 0 : index
    %c0_42 = arith.constant 0 : index
    %50 = vector.load %arg15[%c1_40, %c0_41, %c0_42] : memref<2x8x128xf32, #tpu.memory_space<vmem>>, vector<1x8x128xf32>
    %51 = vector.shape_cast %50 : vector<1x8x128xf32> to vector<8x128xf32>
    %cst_43 = arith.constant dense<0.000000e+00> : vector<8x128xf32>
    %52 = tpu.matmul %51, %13, %cst_43 {dimension_numbers = #tpu.dot_dimension_numbers<[1], [0], [0], [1], [0, 0, 1, 1], [], []>} : vector<8x128xf32>, vector<128x128xf32>, vector<8x128xf32> -> vector<8x128xf32>
    %53 = arith.addf %49, %52 : vector<8x128xf32>
    %54 = vector.broadcast %14 : vector<1x128xf32> to vector<8x128xf32>
    %55 = arith.addf %53, %54 : vector<8x128xf32>
    %56 = math.tanh %55 : vector<8x128xf32>
    %c1_44 = arith.constant 1 : index
    %c0_45 = arith.constant 0 : index
    %c0_46 = arith.constant 0 : index
    %57 = vector.load %arg15[%c1_44, %c0_45, %c0_46] : memref<2x8x128xf32, #tpu.memory_space<vmem>>, vector<1x8x128xf32>
    %58 = vector.shape_cast %57 : vector<1x8x128xf32> to vector<8x128xf32>
    %59 = vector.shape_cast %56 : vector<8x128xf32> to vector<1x8x128xf32>
    tpu.vector_store %arg15[%c1_44, %c0_45, %c0_46], %59 {strides = array<i32>} : memref<2x8x128xf32, #tpu.memory_space<vmem>>, vector<1x8x128xf32>,
    %c1_47 = arith.constant 1 : index
    %c0_48 = arith.constant 0 : index
    %c0_49 = arith.constant 0 : index
    %60 = vector.load %arg13[%c1_47, %c0_48, %c0_49] : memref<8x8x128xf32, #tpu.memory_space<vmem>>, vector<1x8x128xf32>
    %61 = vector.shape_cast %60 : vector<1x8x128xf32> to vector<8x128xf32>
    %62 = vector.shape_cast %56 : vector<8x128xf32> to vector<1x8x128xf32>
    tpu.vector_store %arg13[%c1_47, %c0_48, %c0_49], %62 {strides = array<i32>} : memref<8x8x128xf32, #tpu.memory_space<vmem>>, vector<1x8x128xf32>,
    %63 = vector.extract_strided_slice %10 {offsets = [2, 0, 0], sizes = [1, 8, 128], strides = [1, 1, 1]} : vector<8x8x128xf32> to vector<1x8x128xf32>
    %64 = vector.shape_cast %63 : vector<1x8x128xf32> to vector<8x128xf32>
    %c0_50 = arith.constant 0 : index
    %c0_51 = arith.constant 0 : index
    %c0_52 = arith.constant 0 : index
    %65 = vector.load %arg15[%c0_50, %c0_51, %c0_52] : memref<2x8x128xf32, #tpu.memory_space<vmem>>, vector<1x8x128xf32>
    %66 = vector.shape_cast %65 : vector<1x8x128xf32> to vector<8x128xf32>
    %cst_53 = arith.constant dense<0.000000e+00> : vector<8x128xf32>
    %67 = tpu.matmul %66, %11, %cst_53 {dimension_numbers = #tpu.dot_dimension_numbers<[1], [0], [0], [1], [0, 0, 1, 1], [], []>} : vector<8x128xf32>, vector<128x128xf32>, vector<8x128xf32> -> vector<8x128xf32>
    %68 = arith.addf %64, %67 : vector<8x128xf32>
    %69 = math.tanh %68 : vector<8x128xf32>
    %c0_54 = arith.constant 0 : index
    %c0_55 = arith.constant 0 : index
    %c0_56 = arith.constant 0 : index
    %70 = vector.load %arg15[%c0_54, %c0_55, %c0_56] : memref<2x8x128xf32, #tpu.memory_space<vmem>>, vector<1x8x128xf32>
    %71 = vector.shape_cast %70 : vector<1x8x128xf32> to vector<8x128xf32>
    %72 = vector.shape_cast %69 : vector<8x128xf32> to vector<1x8x128xf32>
    tpu.vector_store %arg15[%c0_54, %c0_55, %c0_56], %72 {strides = array<i32>} : memref<2x8x128xf32, #tpu.memory_space<vmem>>, vector<1x8x128xf32>,
    %cst_57 = arith.constant dense<0.000000e+00> : vector<8x128xf32>
    %73 = tpu.matmul %69, %12, %cst_57 {dimension_numbers = #tpu.dot_dimension_numbers<[1], [0], [0], [1], [0, 0, 1, 1], [], []>} : vector<8x128xf32>, vector<128x128xf32>, vector<8x128xf32> -> vector<8x128xf32>
    %c1_58 = arith.constant 1 : index
    %c0_59 = arith.constant 0 : index
    %c0_60 = arith.constant 0 : index
    %74 = vector.load %arg15[%c1_58, %c0_59, %c0_60] : memref<2x8x128xf32, #tpu.memory_space<vmem>>, vector<1x8x128xf32>
    %75 = vector.shape_cast %74 : vector<1x8x128xf32> to vector<8x128xf32>
    %cst_61 = arith.constant dense<0.000000e+00> : vector<8x128xf32>
    %76 = tpu.matmul %75, %13, %cst_61 {dimension_numbers = #tpu.dot_dimension_numbers<[1], [0], [0], [1], [0, 0, 1, 1], [], []>} : vector<8x128xf32>, vector<128x128xf32>, vector<8x128xf32> -> vector<8x128xf32>
    %77 = arith.addf %73, %76 : vector<8x128xf32>
    %78 = vector.broadcast %14 : vector<1x128xf32> to vector<8x128xf32>
    %79 = arith.addf %77, %78 : vector<8x128xf32>
    %80 = math.tanh %79 : vector<8x128xf32>
    %c1_62 = arith.constant 1 : index
    %c0_63 = arith.constant 0 : index
    %c0_64 = arith.constant 0 : index
    %81 = vector.load %arg15[%c1_62, %c0_63, %c0_64] : memref<2x8x128xf32, #tpu.memory_space<vmem>>, vector<1x8x128xf32>
    %82 = vector.shape_cast %81 : vector<1x8x128xf32> to vector<8x128xf32>
    %83 = vector.shape_cast %80 : vector<8x128xf32> to vector<1x8x128xf32>
    tpu.vector_store %arg15[%c1_62, %c0_63, %c0_64], %83 {strides = array<i32>} : memref<2x8x128xf32, #tpu.memory_space<vmem>>, vector<1x8x128xf32>,
    %c2 = arith.constant 2 : index
    %c0_65 = arith.constant 0 : index
    %c0_66 = arith.constant 0 : index
    %84 = vector.load %arg13[%c2, %c0_65, %c0_66] : memref<8x8x128xf32, #tpu.memory_space<vmem>>, vector<1x8x128xf32>
    %85 = vector.shape_cast %84 : vector<1x8x128xf32> to vector<8x128xf32>
    %86 = vector.shape_cast %80 : vector<8x128xf32> to vector<1x8x128xf32>
    tpu.vector_store %arg13[%c2, %c0_65, %c0_66], %86 {strides = array<i32>} : memref<8x8x128xf32, #tpu.memory_space<vmem>>, vector<1x8x128xf32>,
    %87 = vector.extract_strided_slice %10 {offsets = [3, 0, 0], sizes = [1, 8, 128], strides = [1, 1, 1]} : vector<8x8x128xf32> to vector<1x8x128xf32>
    %88 = vector.shape_cast %87 : vector<1x8x128xf32> to vector<8x128xf32>
    %c0_67 = arith.constant 0 : index
    %c0_68 = arith.constant 0 : index
    %c0_69 = arith.constant 0 : index
    %89 = vector.load %arg15[%c0_67, %c0_68, %c0_69] : memref<2x8x128xf32, #tpu.memory_space<vmem>>, vector<1x8x128xf32>
    %90 = vector.shape_cast %89 : vector<1x8x128xf32> to vector<8x128xf32>
    %cst_70 = arith.constant dense<0.000000e+00> : vector<8x128xf32>
    %91 = tpu.matmul %90, %11, %cst_70 {dimension_numbers = #tpu.dot_dimension_numbers<[1], [0], [0], [1], [0, 0, 1, 1], [], []>} : vector<8x128xf32>, vector<128x128xf32>, vector<8x128xf32> -> vector<8x128xf32>
    %92 = arith.addf %88, %91 : vector<8x128xf32>
    %93 = math.tanh %92 : vector<8x128xf32>
    %c0_71 = arith.constant 0 : index
    %c0_72 = arith.constant 0 : index
    %c0_73 = arith.constant 0 : index
    %94 = vector.load %arg15[%c0_71, %c0_72, %c0_73] : memref<2x8x128xf32, #tpu.memory_space<vmem>>, vector<1x8x128xf32>
    %95 = vector.shape_cast %94 : vector<1x8x128xf32> to vector<8x128xf32>
    %96 = vector.shape_cast %93 : vector<8x128xf32> to vector<1x8x128xf32>
    tpu.vector_store %arg15[%c0_71, %c0_72, %c0_73], %96 {strides = array<i32>} : memref<2x8x128xf32, #tpu.memory_space<vmem>>, vector<1x8x128xf32>,
    %cst_74 = arith.constant dense<0.000000e+00> : vector<8x128xf32>
    %97 = tpu.matmul %93, %12, %cst_74 {dimension_numbers = #tpu.dot_dimension_numbers<[1], [0], [0], [1], [0, 0, 1, 1], [], []>} : vector<8x128xf32>, vector<128x128xf32>, vector<8x128xf32> -> vector<8x128xf32>
    %c1_75 = arith.constant 1 : index
    %c0_76 = arith.constant 0 : index
    %c0_77 = arith.constant 0 : index
    %98 = vector.load %arg15[%c1_75, %c0_76, %c0_77] : memref<2x8x128xf32, #tpu.memory_space<vmem>>, vector<1x8x128xf32>
    %99 = vector.shape_cast %98 : vector<1x8x128xf32> to vector<8x128xf32>
    %cst_78 = arith.constant dense<0.000000e+00> : vector<8x128xf32>
    %100 = tpu.matmul %99, %13, %cst_78 {dimension_numbers = #tpu.dot_dimension_numbers<[1], [0], [0], [1], [0, 0, 1, 1], [], []>} : vector<8x128xf32>, vector<128x128xf32>, vector<8x128xf32> -> vector<8x128xf32>
    %101 = arith.addf %97, %100 : vector<8x128xf32>
    %102 = vector.broadcast %14 : vector<1x128xf32> to vector<8x128xf32>
    %103 = arith.addf %101, %102 : vector<8x128xf32>
    %104 = math.tanh %103 : vector<8x128xf32>
    %c1_79 = arith.constant 1 : index
    %c0_80 = arith.constant 0 : index
    %c0_81 = arith.constant 0 : index
    %105 = vector.load %arg15[%c1_79, %c0_80, %c0_81] : memref<2x8x128xf32, #tpu.memory_space<vmem>>, vector<1x8x128xf32>
    %106 = vector.shape_cast %105 : vector<1x8x128xf32> to vector<8x128xf32>
    %107 = vector.shape_cast %104 : vector<8x128xf32> to vector<1x8x128xf32>
    tpu.vector_store %arg15[%c1_79, %c0_80, %c0_81], %107 {strides = array<i32>} : memref<2x8x128xf32, #tpu.memory_space<vmem>>, vector<1x8x128xf32>,
    %c3 = arith.constant 3 : index
    %c0_82 = arith.constant 0 : index
    %c0_83 = arith.constant 0 : index
    %108 = vector.load %arg13[%c3, %c0_82, %c0_83] : memref<8x8x128xf32, #tpu.memory_space<vmem>>, vector<1x8x128xf32>
    %109 = vector.shape_cast %108 : vector<1x8x128xf32> to vector<8x128xf32>
    %110 = vector.shape_cast %104 : vector<8x128xf32> to vector<1x8x128xf32>
    tpu.vector_store %arg13[%c3, %c0_82, %c0_83], %110 {strides = array<i32>} : memref<8x8x128xf32, #tpu.memory_space<vmem>>, vector<1x8x128xf32>,
    %111 = vector.extract_strided_slice %10 {offsets = [4, 0, 0], sizes = [1, 8, 128], strides = [1, 1, 1]} : vector<8x8x128xf32> to vector<1x8x128xf32>
    %112 = vector.shape_cast %111 : vector<1x8x128xf32> to vector<8x128xf32>
    %c0_84 = arith.constant 0 : index
    %c0_85 = arith.constant 0 : index
    %c0_86 = arith.constant 0 : index
    %113 = vector.load %arg15[%c0_84, %c0_85, %c0_86] : memref<2x8x128xf32, #tpu.memory_space<vmem>>, vector<1x8x128xf32>
    %114 = vector.shape_cast %113 : vector<1x8x128xf32> to vector<8x128xf32>
    %cst_87 = arith.constant dense<0.000000e+00> : vector<8x128xf32>
    %115 = tpu.matmul %114, %11, %cst_87 {dimension_numbers = #tpu.dot_dimension_numbers<[1], [0], [0], [1], [0, 0, 1, 1], [], []>} : vector<8x128xf32>, vector<128x128xf32>, vector<8x128xf32> -> vector<8x128xf32>
    %116 = arith.addf %112, %115 : vector<8x128xf32>
    %117 = math.tanh %116 : vector<8x128xf32>
    %c0_88 = arith.constant 0 : index
    %c0_89 = arith.constant 0 : index
    %c0_90 = arith.constant 0 : index
    %118 = vector.load %arg15[%c0_88, %c0_89, %c0_90] : memref<2x8x128xf32, #tpu.memory_space<vmem>>, vector<1x8x128xf32>
    %119 = vector.shape_cast %118 : vector<1x8x128xf32> to vector<8x128xf32>
    %120 = vector.shape_cast %117 : vector<8x128xf32> to vector<1x8x128xf32>
    tpu.vector_store %arg15[%c0_88, %c0_89, %c0_90], %120 {strides = array<i32>} : memref<2x8x128xf32, #tpu.memory_space<vmem>>, vector<1x8x128xf32>,
    %cst_91 = arith.constant dense<0.000000e+00> : vector<8x128xf32>
    %121 = tpu.matmul %117, %12, %cst_91 {dimension_numbers = #tpu.dot_dimension_numbers<[1], [0], [0], [1], [0, 0, 1, 1], [], []>} : vector<8x128xf32>, vector<128x128xf32>, vector<8x128xf32> -> vector<8x128xf32>
    %c1_92 = arith.constant 1 : index
    %c0_93 = arith.constant 0 : index
    %c0_94 = arith.constant 0 : index
    %122 = vector.load %arg15[%c1_92, %c0_93, %c0_94] : memref<2x8x128xf32, #tpu.memory_space<vmem>>, vector<1x8x128xf32>
    %123 = vector.shape_cast %122 : vector<1x8x128xf32> to vector<8x128xf32>
    %cst_95 = arith.constant dense<0.000000e+00> : vector<8x128xf32>
    %124 = tpu.matmul %123, %13, %cst_95 {dimension_numbers = #tpu.dot_dimension_numbers<[1], [0], [0], [1], [0, 0, 1, 1], [], []>} : vector<8x128xf32>, vector<128x128xf32>, vector<8x128xf32> -> vector<8x128xf32>
    %125 = arith.addf %121, %124 : vector<8x128xf32>
    %126 = vector.broadcast %14 : vector<1x128xf32> to vector<8x128xf32>
    %127 = arith.addf %125, %126 : vector<8x128xf32>
    %128 = math.tanh %127 : vector<8x128xf32>
    %c1_96 = arith.constant 1 : index
    %c0_97 = arith.constant 0 : index
    %c0_98 = arith.constant 0 : index
    %129 = vector.load %arg15[%c1_96, %c0_97, %c0_98] : memref<2x8x128xf32, #tpu.memory_space<vmem>>, vector<1x8x128xf32>
    %130 = vector.shape_cast %129 : vector<1x8x128xf32> to vector<8x128xf32>
    %131 = vector.shape_cast %128 : vector<8x128xf32> to vector<1x8x128xf32>
    tpu.vector_store %arg15[%c1_96, %c0_97, %c0_98], %131 {strides = array<i32>} : memref<2x8x128xf32, #tpu.memory_space<vmem>>, vector<1x8x128xf32>,
    %c4 = arith.constant 4 : index
    %c0_99 = arith.constant 0 : index
    %c0_100 = arith.constant 0 : index
    %132 = vector.load %arg13[%c4, %c0_99, %c0_100] : memref<8x8x128xf32, #tpu.memory_space<vmem>>, vector<1x8x128xf32>
    %133 = vector.shape_cast %132 : vector<1x8x128xf32> to vector<8x128xf32>
    %134 = vector.shape_cast %128 : vector<8x128xf32> to vector<1x8x128xf32>
    tpu.vector_store %arg13[%c4, %c0_99, %c0_100], %134 {strides = array<i32>} : memref<8x8x128xf32, #tpu.memory_space<vmem>>, vector<1x8x128xf32>,
    %135 = vector.extract_strided_slice %10 {offsets = [5, 0, 0], sizes = [1, 8, 128], strides = [1, 1, 1]} : vector<8x8x128xf32> to vector<1x8x128xf32>
    %136 = vector.shape_cast %135 : vector<1x8x128xf32> to vector<8x128xf32>
    %c0_101 = arith.constant 0 : index
    %c0_102 = arith.constant 0 : index
    %c0_103 = arith.constant 0 : index
    %137 = vector.load %arg15[%c0_101, %c0_102, %c0_103] : memref<2x8x128xf32, #tpu.memory_space<vmem>>, vector<1x8x128xf32>
    %138 = vector.shape_cast %137 : vector<1x8x128xf32> to vector<8x128xf32>
    %cst_104 = arith.constant dense<0.000000e+00> : vector<8x128xf32>
    %139 = tpu.matmul %138, %11, %cst_104 {dimension_numbers = #tpu.dot_dimension_numbers<[1], [0], [0], [1], [0, 0, 1, 1], [], []>} : vector<8x128xf32>, vector<128x128xf32>, vector<8x128xf32> -> vector<8x128xf32>
    %140 = arith.addf %136, %139 : vector<8x128xf32>
    %141 = math.tanh %140 : vector<8x128xf32>
    %c0_105 = arith.constant 0 : index
    %c0_106 = arith.constant 0 : index
    %c0_107 = arith.constant 0 : index
    %142 = vector.load %arg15[%c0_105, %c0_106, %c0_107] : memref<2x8x128xf32, #tpu.memory_space<vmem>>, vector<1x8x128xf32>
    %143 = vector.shape_cast %142 : vector<1x8x128xf32> to vector<8x128xf32>
    %144 = vector.shape_cast %141 : vector<8x128xf32> to vector<1x8x128xf32>
    tpu.vector_store %arg15[%c0_105, %c0_106, %c0_107], %144 {strides = array<i32>} : memref<2x8x128xf32, #tpu.memory_space<vmem>>, vector<1x8x128xf32>,
    %cst_108 = arith.constant dense<0.000000e+00> : vector<8x128xf32>
    %145 = tpu.matmul %141, %12, %cst_108 {dimension_numbers = #tpu.dot_dimension_numbers<[1], [0], [0], [1], [0, 0, 1, 1], [], []>} : vector<8x128xf32>, vector<128x128xf32>, vector<8x128xf32> -> vector<8x128xf32>
    %c1_109 = arith.constant 1 : index
    %c0_110 = arith.constant 0 : index
    %c0_111 = arith.constant 0 : index
    %146 = vector.load %arg15[%c1_109, %c0_110, %c0_111] : memref<2x8x128xf32, #tpu.memory_space<vmem>>, vector<1x8x128xf32>
    %147 = vector.shape_cast %146 : vector<1x8x128xf32> to vector<8x128xf32>
    %cst_112 = arith.constant dense<0.000000e+00> : vector<8x128xf32>
    %148 = tpu.matmul %147, %13, %cst_112 {dimension_numbers = #tpu.dot_dimension_numbers<[1], [0], [0], [1], [0, 0, 1, 1], [], []>} : vector<8x128xf32>, vector<128x128xf32>, vector<8x128xf32> -> vector<8x128xf32>
    %149 = arith.addf %145, %148 : vector<8x128xf32>
    %150 = vector.broadcast %14 : vector<1x128xf32> to vector<8x128xf32>
    %151 = arith.addf %149, %150 : vector<8x128xf32>
    %152 = math.tanh %151 : vector<8x128xf32>
    %c1_113 = arith.constant 1 : index
    %c0_114 = arith.constant 0 : index
    %c0_115 = arith.constant 0 : index
    %153 = vector.load %arg15[%c1_113, %c0_114, %c0_115] : memref<2x8x128xf32, #tpu.memory_space<vmem>>, vector<1x8x128xf32>
    %154 = vector.shape_cast %153 : vector<1x8x128xf32> to vector<8x128xf32>
    %155 = vector.shape_cast %152 : vector<8x128xf32> to vector<1x8x128xf32>
    tpu.vector_store %arg15[%c1_113, %c0_114, %c0_115], %155 {strides = array<i32>} : memref<2x8x128xf32, #tpu.memory_space<vmem>>, vector<1x8x128xf32>,
    %c5 = arith.constant 5 : index
    %c0_116 = arith.constant 0 : index
    %c0_117 = arith.constant 0 : index
    %156 = vector.load %arg13[%c5, %c0_116, %c0_117] : memref<8x8x128xf32, #tpu.memory_space<vmem>>, vector<1x8x128xf32>
    %157 = vector.shape_cast %156 : vector<1x8x128xf32> to vector<8x128xf32>
    %158 = vector.shape_cast %152 : vector<8x128xf32> to vector<1x8x128xf32>
    tpu.vector_store %arg13[%c5, %c0_116, %c0_117], %158 {strides = array<i32>} : memref<8x8x128xf32, #tpu.memory_space<vmem>>, vector<1x8x128xf32>,
    %159 = vector.extract_strided_slice %10 {offsets = [6, 0, 0], sizes = [1, 8, 128], strides = [1, 1, 1]} : vector<8x8x128xf32> to vector<1x8x128xf32>
    %160 = vector.shape_cast %159 : vector<1x8x128xf32> to vector<8x128xf32>
    %c0_118 = arith.constant 0 : index
    %c0_119 = arith.constant 0 : index
    %c0_120 = arith.constant 0 : index
    %161 = vector.load %arg15[%c0_118, %c0_119, %c0_120] : memref<2x8x128xf32, #tpu.memory_space<vmem>>, vector<1x8x128xf32>
    %162 = vector.shape_cast %161 : vector<1x8x128xf32> to vector<8x128xf32>
    %cst_121 = arith.constant dense<0.000000e+00> : vector<8x128xf32>
    %163 = tpu.matmul %162, %11, %cst_121 {dimension_numbers = #tpu.dot_dimension_numbers<[1], [0], [0], [1], [0, 0, 1, 1], [], []>} : vector<8x128xf32>, vector<128x128xf32>, vector<8x128xf32> -> vector<8x128xf32>
    %164 = arith.addf %160, %163 : vector<8x128xf32>
    %165 = math.tanh %164 : vector<8x128xf32>
    %c0_122 = arith.constant 0 : index
    %c0_123 = arith.constant 0 : index
    %c0_124 = arith.constant 0 : index
    %166 = vector.load %arg15[%c0_122, %c0_123, %c0_124] : memref<2x8x128xf32, #tpu.memory_space<vmem>>, vector<1x8x128xf32>
    %167 = vector.shape_cast %166 : vector<1x8x128xf32> to vector<8x128xf32>
    %168 = vector.shape_cast %165 : vector<8x128xf32> to vector<1x8x128xf32>
    tpu.vector_store %arg15[%c0_122, %c0_123, %c0_124], %168 {strides = array<i32>} : memref<2x8x128xf32, #tpu.memory_space<vmem>>, vector<1x8x128xf32>,
    %cst_125 = arith.constant dense<0.000000e+00> : vector<8x128xf32>
    %169 = tpu.matmul %165, %12, %cst_125 {dimension_numbers = #tpu.dot_dimension_numbers<[1], [0], [0], [1], [0, 0, 1, 1], [], []>} : vector<8x128xf32>, vector<128x128xf32>, vector<8x128xf32> -> vector<8x128xf32>
    %c1_126 = arith.constant 1 : index
    %c0_127 = arith.constant 0 : index
    %c0_128 = arith.constant 0 : index
    %170 = vector.load %arg15[%c1_126, %c0_127, %c0_128] : memref<2x8x128xf32, #tpu.memory_space<vmem>>, vector<1x8x128xf32>
    %171 = vector.shape_cast %170 : vector<1x8x128xf32> to vector<8x128xf32>
    %cst_129 = arith.constant dense<0.000000e+00> : vector<8x128xf32>
    %172 = tpu.matmul %171, %13, %cst_129 {dimension_numbers = #tpu.dot_dimension_numbers<[1], [0], [0], [1], [0, 0, 1, 1], [], []>} : vector<8x128xf32>, vector<128x128xf32>, vector<8x128xf32> -> vector<8x128xf32>
    %173 = arith.addf %169, %172 : vector<8x128xf32>
    %174 = vector.broadcast %14 : vector<1x128xf32> to vector<8x128xf32>
    %175 = arith.addf %173, %174 : vector<8x128xf32>
    %176 = math.tanh %175 : vector<8x128xf32>
    %c1_130 = arith.constant 1 : index
    %c0_131 = arith.constant 0 : index
    %c0_132 = arith.constant 0 : index
    %177 = vector.load %arg15[%c1_130, %c0_131, %c0_132] : memref<2x8x128xf32, #tpu.memory_space<vmem>>, vector<1x8x128xf32>
    %178 = vector.shape_cast %177 : vector<1x8x128xf32> to vector<8x128xf32>
    %179 = vector.shape_cast %176 : vector<8x128xf32> to vector<1x8x128xf32>
    tpu.vector_store %arg15[%c1_130, %c0_131, %c0_132], %179 {strides = array<i32>} : memref<2x8x128xf32, #tpu.memory_space<vmem>>, vector<1x8x128xf32>,
    %c6 = arith.constant 6 : index
    %c0_133 = arith.constant 0 : index
    %c0_134 = arith.constant 0 : index
    %180 = vector.load %arg13[%c6, %c0_133, %c0_134] : memref<8x8x128xf32, #tpu.memory_space<vmem>>, vector<1x8x128xf32>
    %181 = vector.shape_cast %180 : vector<1x8x128xf32> to vector<8x128xf32>
    %182 = vector.shape_cast %176 : vector<8x128xf32> to vector<1x8x128xf32>
    tpu.vector_store %arg13[%c6, %c0_133, %c0_134], %182 {strides = array<i32>} : memref<8x8x128xf32, #tpu.memory_space<vmem>>, vector<1x8x128xf32>,
    %183 = vector.extract_strided_slice %10 {offsets = [7, 0, 0], sizes = [1, 8, 128], strides = [1, 1, 1]} : vector<8x8x128xf32> to vector<1x8x128xf32>
    %184 = vector.shape_cast %183 : vector<1x8x128xf32> to vector<8x128xf32>
    %c0_135 = arith.constant 0 : index
    %c0_136 = arith.constant 0 : index
    %c0_137 = arith.constant 0 : index
    %185 = vector.load %arg15[%c0_135, %c0_136, %c0_137] : memref<2x8x128xf32, #tpu.memory_space<vmem>>, vector<1x8x128xf32>
    %186 = vector.shape_cast %185 : vector<1x8x128xf32> to vector<8x128xf32>
    %cst_138 = arith.constant dense<0.000000e+00> : vector<8x128xf32>
    %187 = tpu.matmul %186, %11, %cst_138 {dimension_numbers = #tpu.dot_dimension_numbers<[1], [0], [0], [1], [0, 0, 1, 1], [], []>} : vector<8x128xf32>, vector<128x128xf32>, vector<8x128xf32> -> vector<8x128xf32>
    %188 = arith.addf %184, %187 : vector<8x128xf32>
    %189 = math.tanh %188 : vector<8x128xf32>
    %c0_139 = arith.constant 0 : index
    %c0_140 = arith.constant 0 : index
    %c0_141 = arith.constant 0 : index
    %190 = vector.load %arg15[%c0_139, %c0_140, %c0_141] : memref<2x8x128xf32, #tpu.memory_space<vmem>>, vector<1x8x128xf32>
    %191 = vector.shape_cast %190 : vector<1x8x128xf32> to vector<8x128xf32>
    %192 = vector.shape_cast %189 : vector<8x128xf32> to vector<1x8x128xf32>
    tpu.vector_store %arg15[%c0_139, %c0_140, %c0_141], %192 {strides = array<i32>} : memref<2x8x128xf32, #tpu.memory_space<vmem>>, vector<1x8x128xf32>,
    %cst_142 = arith.constant dense<0.000000e+00> : vector<8x128xf32>
    %193 = tpu.matmul %189, %12, %cst_142 {dimension_numbers = #tpu.dot_dimension_numbers<[1], [0], [0], [1], [0, 0, 1, 1], [], []>} : vector<8x128xf32>, vector<128x128xf32>, vector<8x128xf32> -> vector<8x128xf32>
    %c1_143 = arith.constant 1 : index
    %c0_144 = arith.constant 0 : index
    %c0_145 = arith.constant 0 : index
    %194 = vector.load %arg15[%c1_143, %c0_144, %c0_145] : memref<2x8x128xf32, #tpu.memory_space<vmem>>, vector<1x8x128xf32>
    %195 = vector.shape_cast %194 : vector<1x8x128xf32> to vector<8x128xf32>
    %cst_146 = arith.constant dense<0.000000e+00> : vector<8x128xf32>
    %196 = tpu.matmul %195, %13, %cst_146 {dimension_numbers = #tpu.dot_dimension_numbers<[1], [0], [0], [1], [0, 0, 1, 1], [], []>} : vector<8x128xf32>, vector<128x128xf32>, vector<8x128xf32> -> vector<8x128xf32>
    %197 = arith.addf %193, %196 : vector<8x128xf32>
    %198 = vector.broadcast %14 : vector<1x128xf32> to vector<8x128xf32>
    %199 = arith.addf %197, %198 : vector<8x128xf32>
    %200 = math.tanh %199 : vector<8x128xf32>
    %c1_147 = arith.constant 1 : index
    %c0_148 = arith.constant 0 : index
    %c0_149 = arith.constant 0 : index
    %201 = vector.load %arg15[%c1_147, %c0_148, %c0_149] : memref<2x8x128xf32, #tpu.memory_space<vmem>>, vector<1x8x128xf32>
    %202 = vector.shape_cast %201 : vector<1x8x128xf32> to vector<8x128xf32>
    %203 = vector.shape_cast %200 : vector<8x128xf32> to vector<1x8x128xf32>
    tpu.vector_store %arg15[%c1_147, %c0_148, %c0_149], %203 {strides = array<i32>} : memref<2x8x128xf32, #tpu.memory_space<vmem>>, vector<1x8x128xf32>,
    %c7 = arith.constant 7 : index
    %c0_150 = arith.constant 0 : index
    %c0_151 = arith.constant 0 : index
    %204 = vector.load %arg13[%c7, %c0_150, %c0_151] : memref<8x8x128xf32, #tpu.memory_space<vmem>>, vector<1x8x128xf32>
    %205 = vector.shape_cast %204 : vector<1x8x128xf32> to vector<8x128xf32>
    %206 = vector.shape_cast %200 : vector<8x128xf32> to vector<1x8x128xf32>
    tpu.vector_store %arg13[%c7, %c0_150, %c0_151], %206 {strides = array<i32>} : memref<8x8x128xf32, #tpu.memory_space<vmem>>, vector<1x8x128xf32>,
    %c0_152 = arith.constant 0 : index
    %c0_153 = arith.constant 0 : index
    %c0_154 = arith.constant 0 : index
    %207 = vector.load %arg13[%c0_152, %c0_153, %c0_154] : memref<8x8x128xf32, #tpu.memory_space<vmem>>, vector<8x8x128xf32>
    %208 = vector.shape_cast %207 : vector<8x8x128xf32> to vector<64x128xf32>
    %c0_155 = arith.constant 0 : index
    %c0_156 = arith.constant 0 : index
    %209 = vector.load %arg9[%c0_155, %c0_156] : memref<128x128xf32, #tpu.memory_space<vmem>>, vector<128x128xf32>
    %c0_157 = arith.constant 0 : index
    %c0_158 = arith.constant 0 : index
    %210 = vector.load %arg10[%c0_157, %c0_158] : memref<1x128xf32, #tpu.memory_space<vmem>>, vector<1x128xf32>
    %cst_159 = arith.constant dense<0.000000e+00> : vector<64x128xf32>
    %211 = tpu.matmul %208, %209, %cst_159 {dimension_numbers = #tpu.dot_dimension_numbers<[1], [0], [0], [1], [0, 0, 1, 1], [], []>} : vector<64x128xf32>, vector<128x128xf32>, vector<64x128xf32> -> vector<64x128xf32>
    %212 = vector.broadcast %210 : vector<1x128xf32> to vector<64x128xf32>
    %213 = arith.addf %211, %212 : vector<64x128xf32>
    %cst_160 = arith.constant 0.000000e+00 : f32
    %214 = vector.broadcast %cst_160 : f32 to vector<64x128xf32>
    %215 = arith.maximumf %213, %214 : vector<64x128xf32>
    %c0_161 = arith.constant 0 : index
    %c0_162 = arith.constant 0 : index
    %216 = vector.load %arg11[%c0_161, %c0_162] : memref<128x128xf32, #tpu.memory_space<vmem>>, vector<128x128xf32>
    %c0_163 = arith.constant 0 : index
    %c0_164 = arith.constant 0 : index
    %217 = vector.load %arg12[%c0_163, %c0_164] : memref<1x128xf32, #tpu.memory_space<vmem>>, vector<1x128xf32>
    %cst_165 = arith.constant dense<0.000000e+00> : vector<64x128xf32>
    %218 = tpu.matmul %215, %216, %cst_165 {dimension_numbers = #tpu.dot_dimension_numbers<[1], [0], [0], [1], [0, 0, 1, 1], [], []>} : vector<64x128xf32>, vector<128x128xf32>, vector<64x128xf32> -> vector<64x128xf32>
    %219 = vector.broadcast %217 : vector<1x128xf32> to vector<64x128xf32>
    %220 = arith.addf %218, %219 : vector<64x128xf32>
    %221 = vector.shape_cast %220 : vector<64x128xf32> to vector<8x8x128xf32>
    %c0_166 = arith.constant 0 : index
    %c0_167 = arith.constant 0 : index
    %c0_168 = arith.constant 0 : index
    %222 = vector.load %arg14[%c0_166, %c0_167, %c0_168] : memref<8x8x128xf32, #tpu.memory_space<vmem>>, vector<8x8x128xf32>
    tpu.vector_store %arg14[%c0_166, %c0_167, %c0_168], %221 {strides = array<i32>} : memref<8x8x128xf32, #tpu.memory_space<vmem>>, vector<8x8x128xf32>,
    return
  }
  func.func @transform_0(%arg0: i32, %arg1: i32) -> (i32, i32, i32) {
    %c0_i32 = arith.constant 0 : i32
    %c0_i32_0 = arith.constant 0 : i32
    return %arg1, %arg0, %c0_i32 : i32, i32, i32
  }
  func.func @transform_1(%arg0: i32, %arg1: i32) -> (i32, i32) {
    %c0_i32 = arith.constant 0 : i32
    %c0_i32_0 = arith.constant 0 : i32
    %c0_i32_1 = arith.constant 0 : i32
    return %c0_i32, %c0_i32_0 : i32, i32
  }
  func.func @transform_2(%arg0: i32, %arg1: i32) -> (i32, i32) {
    %c0_i32 = arith.constant 0 : i32
    %c0_i32_0 = arith.constant 0 : i32
    %c0_i32_1 = arith.constant 0 : i32
    return %c0_i32, %c0_i32_0 : i32, i32
  }
  func.func @transform_3(%arg0: i32, %arg1: i32) -> (i32, i32) {
    %c0_i32 = arith.constant 0 : i32
    %c0_i32_0 = arith.constant 0 : i32
    %c0_i32_1 = arith.constant 0 : i32
    return %c0_i32, %c0_i32_0 : i32, i32
  }
  func.func @transform_4(%arg0: i32, %arg1: i32) -> (i32, i32) {
    %c0_i32 = arith.constant 0 : i32
    %c0_i32_0 = arith.constant 0 : i32
    %c0_i32_1 = arith.constant 0 : i32
    return %c0_i32, %c0_i32_0 : i32, i32
  }
  func.func @transform_5(%arg0: i32, %arg1: i32) -> (i32, i32) {
    %c0_i32 = arith.constant 0 : i32
    %c0_i32_0 = arith.constant 0 : i32
    %c0_i32_1 = arith.constant 0 : i32
    return %c0_i32, %c0_i32_0 : i32, i32
  }
  func.func @transform_6(%arg0: i32, %arg1: i32) -> (i32, i32) {
    %c0_i32 = arith.constant 0 : i32
    %c0_i32_0 = arith.constant 0 : i32
    %c0_i32_1 = arith.constant 0 : i32
    return %c0_i32, %c0_i32_0 : i32, i32
  }
  func.func @transform_7(%arg0: i32, %arg1: i32) -> (i32, i32) {
    %c0_i32 = arith.constant 0 : i32
    %c0_i32_0 = arith.constant 0 : i32
    %c0_i32_1 = arith.constant 0 : i32
    return %c0_i32, %c0_i32_0 : i32, i32
  }
  func.func @transform_8(%arg0: i32, %arg1: i32) -> (i32, i32) {
    %c0_i32 = arith.constant 0 : i32
    %c0_i32_0 = arith.constant 0 : i32
    %c0_i32_1 = arith.constant 0 : i32
    return %c0_i32, %c0_i32_0 : i32, i32
  }
  func.func @transform_9(%arg0: i32, %arg1: i32) -> (i32, i32) {
    %c0_i32 = arith.constant 0 : i32
    %c0_i32_0 = arith.constant 0 : i32
    %c0_i32_1 = arith.constant 0 : i32
    return %c0_i32, %c0_i32_0 : i32, i32
  }
  func.func @transform_10(%arg0: i32, %arg1: i32) -> (i32, i32) {
    %c0_i32 = arith.constant 0 : i32
    %c0_i32_0 = arith.constant 0 : i32
    %c0_i32_1 = arith.constant 0 : i32
    return %c0_i32, %c0_i32_0 : i32, i32
  }
  func.func @transform_11(%arg0: i32, %arg1: i32) -> (i32, i32, i32) {
    %c0_i32 = arith.constant 0 : i32
    %c0_i32_0 = arith.constant 0 : i32
    return %arg1, %arg0, %c0_i32 : i32, i32, i32
  }
  func.func @transform_12(%arg0: i32, %arg1: i32) -> (i32, i32, i32) {
    %c0_i32 = arith.constant 0 : i32
    %c0_i32_0 = arith.constant 0 : i32
    return %arg1, %arg0, %c0_i32 : i32, i32, i32
  }
}

</mosaic_0001>

<bundles_post_ra>
// kernel: tpu_custom_call.1
= control target key start
LH: loop header
LB: loop body
LE: loop exit
PB: predicated region body
PF: predicated region fallthrough
CT: control target
= control target key end

     0   :  { %18 = vsyncpa [#allocation4], 0  ;;  %s5476_s0 = inlined_call_operand.vmem [shape: f32[8,8,7], index: 0, kind: input, shape index: {}]   ;;  %s5477_s1 = inlined_call_operand.hbm [shape: f32[7,128], index: 1, kind: input, shape index: {}]   ;;  %s5478_s2 = inlined_call_operand.hbm [shape: f32[128,128], index: 2, kind: input, shape index: {}]   ;;  %s5479_s3 = inlined_call_operand.vmem [shape: f32[1,128], index: 3, kind: input, shape index: {}]   ;;  %s5480_s4 = inlined_call_operand.vmem [shape: f32[128,128], index: 4, kind: input, shape index: {}]   ;;  %s5481_s5 = inlined_call_operand.hbm [shape: f32[128,128], index: 5, kind: input, shape index: {}]   ;;  %s5482_s6 = inlined_call_operand.vmem [shape: f32[1,128], index: 6, kind: input, shape index: {}]   ;;  %s5483_s7 = inlined_call_operand.hbm [shape: f32[128,128], index: 7, kind: input, shape index: {}]   ;;  %s5484_s8 = inlined_call_operand.vmem [shape: f32[1,128], index: 8, kind: input, shape index: {}]   ;;  %s5485_s9 = inlined_call_operand.hbm [shape: f32[128,128], index: 9, kind: input, shape index: {}]   ;;  %s5486_s10 = inlined_call_operand.vmem [shape: f32[1,128], index: 10, kind: input, shape index: {}]   ;;  %s5487_s11 = inlined_call_operand.hbm [shape: f32[8,8,128], index: 11, kind: output, shape index: {0}]   ;;  %s5488_s12 = inlined_call_operand.hbm [shape: f32[8,8,128], index: 12, kind: output, shape index: {1}]  }
   0x1   :  { %19 = vsyncpa [#allocation7], 0 }
   0x2   :  { %20 = vsyncpa [#allocation10], 0 }
   0x3   :  { %21 = vsyncpa [#allocation5], 0 }
   0x4   :  { %22 = vsyncpa [#allocation14], 0  ;;  %s4663_s21 = smov [#allocation6]   ;;  %s4499_s25 = scalar_lea.hbm %s5478_s2, 2048 }
   0x5   :  { %s40_s22 = sshll.u32 %s4663_s21, 4  ;;  %p4500_p0 = scmp.ne.s32.totalorder %s5478_s2, %s4499_s25  ;;  %s41_s22 = int_to_ptr.vmem [resolvable:$true] %s40_s22 }
   0x6   :  { %p4503_p1 = scmp.lt.u32.totalorder %s4499_s25, %s5478_s2 }
   0x8   :  { %p4505_p2 = pnand %p4503_p1, %p4500_p0 }
   0xa   :  { %4508 = shalt.err (!%p4505_p2)
}
   0xb   :  { %s4509_s30 = scalar_lea.vmem %s41_s22, 2048  ;;  %p4514_p4 = scmp.lt.s32.totalorder %s41_s22, %s41_s22 }
   0xc   :  { %p4510_p3 = scmp.ne.s32.totalorder %s41_s22, %s4509_s30  ;;  %p4515_p5 = scmp.lt.s32.totalorder %s4509_s30, %s4509_s30 }
   0xe   :  { %p4516_p6 = por %p4515_p5, %p4514_p4 }
  0x10   :  { %p4517_p7 = pnand %p4516_p6, %p4510_p3 }
  0x12   :  { %4520 = shalt.err (!%p4517_p7)
}
  0x13   :  { %s4664_s13 = smov 128   ;;  %s4665_s14 = smov 8  }
  0x14   :  { %46 = dma.hbm_to_vmem [thread:$0]  %s5478_s2, 2048, %s41_s22, [#allocation7], %s4664_s13, %s4664_s13, %s4665_s14  }
  0x15   :  { %s4666_s17 = smov [#allocation9]   ;;  %s4667_s19 = smov [#allocation3]  }
  0x16   :  { %s70_s18 = sshll.u32 %s4666_s17, 4  ;;  %s31_s20 = sshll.u32 %s4667_s19, 4  ;;  %s71_s18 = int_to_ptr.vmem [resolvable:$true] %s70_s18  ;;  %s32_s20 = int_to_ptr.vmem [resolvable:$true] %s31_s20 }
  0x17   :  { %s4521_s24 = scalar_lea.hbm %s5483_s7, 2048 }
  0x18   :  { %p4522_p8 = scmp.ne.s32.totalorder %s5483_s7, %s4521_s24  ;;  %p4525_p9 = scmp.lt.u32.totalorder %s4521_s24, %s5483_s7 }
  0x1a   :  { %p4527_p10 = pnand %p4525_p9, %p4522_p8 }
  0x1c   :  { %4530 = shalt.err (!%p4527_p10)
}
  0x1d   :  { %s4531_s2 = scalar_lea.vmem %s71_s18, 2048  ;;  %p4536_p12 = scmp.lt.s32.totalorder %s71_s18, %s71_s18 }
  0x1e   :  { %p4532_p11 = scmp.ne.s32.totalorder %s71_s18, %s4531_s2  ;;  %p4537_p13 = scmp.lt.s32.totalorder %s4531_s2, %s4531_s2 }
  0x20   :  { %p4538_p0 = por %p4537_p13, %p4536_p12 }
  0x22   :  { %p4539_p1 = pnand %p4538_p0, %p4532_p11 }
  0x24   :  { %4542 = shalt.err (!%p4539_p1)
}
  0x25   :  { %76 = dma.hbm_to_vmem [thread:$0]  %s5483_s7, 2048, %s71_s18, [#allocation10], %s4664_s13, %s4664_s13, %s4665_s14  }
  0x26   :  { %s4543_s16 = scalar_lea.hbm %s5477_s1, 128 }
  0x27   :  { %p4544_p2 = scmp.ne.s32.totalorder %s5477_s1, %s4543_s16  ;;  %p4547_p3 = scmp.lt.u32.totalorder %s4543_s16, %s5477_s1 }
  0x29   :  { %p4549_p4 = pnand %p4547_p3, %p4544_p2 }
  0x2b   :  { %4552 = shalt.err (!%p4549_p4)
}
  0x2c   :  { %s4553_s24 = scalar_lea.vmem %s32_s20, 128  ;;  %p4558_p6 = scmp.lt.s32.totalorder %s32_s20, %s32_s20 }
  0x2d   :  { %p4554_p5 = scmp.ne.s32.totalorder %s32_s20, %s4553_s24  ;;  %p4559_p7 = scmp.lt.s32.totalorder %s4553_s24, %s4553_s24 }
  0x2f   :  { %p4560_p8 = por %p4559_p7, %p4558_p6 }
  0x31   :  { %p4561_p9 = pnand %p4560_p8, %p4554_p5 }
  0x33   :  { %4564 = shalt.err (!%p4561_p9)
}
  0x34   :  { %34 = dma.hbm_to_vmem [thread:$0]  %s5477_s1, 128, %s32_s20, [#allocation4]  }
  0x35   :  { %s4668_s25 = smov [#allocation8]   ;;  %s4669_s27 = smov [#allocation11]  }
  0x36   :  { %s56_s26 = sshll.u32 %s4668_s25, 4  ;;  %s84_s28 = sshll.u32 %s4669_s27, 4  ;;  %s57_s26 = int_to_ptr.vmem [resolvable:$true] %s56_s26  ;;  %s85_s28 = int_to_ptr.vmem [resolvable:$true] %s84_s28 }
  0x37   :  { %s4565_s29 = scalar_lea.hbm %s5481_s5, 2048 }
  0x38   :  { %p4566_p10 = scmp.ne.s32.totalorder %s5481_s5, %s4565_s29  ;;  %p4569_p11 = scmp.lt.u32.totalorder %s4565_s29, %s5481_s5 }
  0x3a   :  { %p4571_p12 = pnand %p4569_p11, %p4566_p10 }
  0x3c   :  { %4574 = shalt.err (!%p4571_p12)
}
  0x3d   :  { %s4575_s1 = scalar_lea.vmem %s57_s26, 2048  ;;  %p4580_p0 = scmp.lt.s32.totalorder %s57_s26, %s57_s26 }
  0x3e   :  { %p4576_p13 = scmp.ne.s32.totalorder %s57_s26, %s4575_s1  ;;  %p4581_p1 = scmp.lt.s32.totalorder %s4575_s1, %s4575_s1 }
  0x40   :  { %p4582_p2 = por %p4581_p1, %p4580_p0 }
  0x42   :  { %p4583_p3 = pnand %p4582_p2, %p4576_p13 }
  0x44   :  { %4586 = shalt.err (!%p4583_p3)
}
  0x45   :  { %62 = dma.hbm_to_vmem [thread:$0]  %s5481_s5, 2048, %s57_s26, [#allocation7], %s4664_s13, %s4664_s13, %s4665_s14  }
  0x46   :  { %s4587_s24 = scalar_lea.hbm %s5485_s9, 2048 }
  0x47   :  { %p4588_p4 = scmp.ne.s32.totalorder %s5485_s9, %s4587_s24  ;;  %p4591_p5 = scmp.lt.u32.totalorder %s4587_s24, %s5485_s9 }
  0x49   :  { %p4593_p6 = pnand %p4591_p5, %p4588_p4 }
  0x4b   :  { %4596 = shalt.err (!%p4593_p6)
}
  0x4c   :  { %s4597_s2 = scalar_lea.vmem %s85_s28, 2048  ;;  %p4602_p8 = scmp.lt.s32.totalorder %s85_s28, %s85_s28 }
  0x4d   :  { %p4598_p7 = scmp.ne.s32.totalorder %s85_s28, %s4597_s2  ;;  %p4603_p9 = scmp.lt.s32.totalorder %s4597_s2, %s4597_s2 }
  0x4f   :  { %p4604_p10 = por %p4603_p9, %p4602_p8 }
  0x51   :  { %p4605_p11 = pnand %p4604_p10, %p4598_p7 }
  0x53   :  { %4608 = shalt.err (!%p4605_p11)
}
  0x54   :  { %90 = dma.hbm_to_vmem [thread:$0]  %s5485_s9, 2048, %s85_s28, [#allocation10], %s4664_s13, %s4664_s13, %s4665_s14  }
  0x55   :  { %4653 = dma.done.wait [#allocation4], 128  }
  0x56   :  { %4654 = vsyncadd [#allocation4], 4294967168 }
  0x57   :  { %4655 = dma.done.wait [#allocation7], 4096  }
  0x58   :  { %4656 = vsyncadd [#allocation7], 4294963200 }
  0x59   :  { %4657 = dma.done.wait [#allocation10], 4096  }
  0x5a   :  { %4658 = vsyncadd [#allocation10], 4294963200  ;;  %v4670_v0 = vmov 0.0|0.0   ;;  %vm4671_vm0 = vmmov 0   ;;  %v4672_v1 = vmov 0.0   ;;  %v264_v2 = vld [vmem:[#allocation6] sm:$0xff] }
  0x5b   :  { %3814 = vmatprep.subr.bf16.mxu1 %v4670_v0  ;;  %2918 = vmatprep.mubr.msk.f32.mxu1 %vm4671_vm0, %v4672_v1  ;;  %v265_v3 = vld [vmem:[#allocation6 + $0x8] sm:$0xff]  ;;  %v266_v4 = vld [vmem:[#allocation6 + $0x10] sm:$0xff]  ;;  %v267_v6 = vld [vmem:[#allocation6 + $0x18] sm:$0xff]  ;;  %vm155_vm1 = vcmask 1046528   ;;  %vm130_vm2 = vcmask 56320   ;;  %s4673_s19 = smov [#allocation12]  }
  0x5c   :  { %v4815_v5 = vpack.c.bf16 %v265_v3, %v264_v2  ;;  %v4818_v7 = vpack.c.bf16 %v267_v6, %v266_v4  ;;  %v268_v8 = vld [vmem:[#allocation6 + $0x20] sm:$0xff]  ;;  %v269_v9 = vld [vmem:[#allocation6 + $0x28] sm:$0xff]  ;;  %v122_v10 = vld [vmem:[#allocation3] sm:$0x7f] }
  0x5d   :  { %2872 = vmatprep.subr.msk.mxu0 %vm155_vm1, %v122_v10  ;;  %v114_v11 = vld [vmem:[%s5476_s0] sm:$0xff]  ;;  %v115_v12 = vld [vmem:[%s5476_s0 + $0x8] sm:$0xff]  ;;  %v297_v14 = vld [vmem:[#allocation8 + $0x8] sm:$0xff]  ;;  %v4829_v15 = vpack.c.bf16 %v269_v9, %v268_v8 }
  0x5e   :  { %3816 = vmatpush3.bf16.msra.mxu1 %v4815_v5  ;;  %2873 = vmatpush3.msk.msra.mxu0 %vm155_vm1, %v122_v10  ;;  %v296_v13 = vld [vmem:[#allocation8] sm:$0xff]  ;;  %v298_v17 = vld [vmem:[#allocation8 + $0x10] sm:$0xff]  ;;  %v299_v18 = vld [vmem:[#allocation8 + $0x18] sm:$0xff] }
  0x5f   :  { %3817 = vmatprep.subr.bf16.mxu1 %v4670_v0  ;;  %2874 = vmatprep.mubr.msk.f32.mxu0 %vm130_vm2, %v114_v11  ;;  %v4832_v16 = vpack.c.bf16 %v297_v14, %v296_v13  ;;  %v270_v19 = vld [vmem:[#allocation6 + $0x30] sm:$0xff]  ;;  %v271_v20 = vld [vmem:[#allocation6 + $0x38] sm:$0xff]  ;;  %v4837_v21 = vpack.c.bf16 %v299_v18, %v298_v17  ;;  %v116_v22 = vld [vmem:[%s5476_s0 + $0x10] sm:$0xff] }
  0x60   :  { %2875 = vmatmul.mubr.msk.f32.vlgmr.msra.gmra.mrb[0].mxu0 %vm130_vm2, %v115_v12  ;;  %3838 = vmatprep.subr.bf16.mxu0 %v4670_v0  ;;  %v300_v23 = vld [vmem:[#allocation8 + $0x20] sm:$0xff]  ;;  %v301_v24 = vld [vmem:[#allocation8 + $0x28] sm:$0xff]  ;;  %v117_v25 = vld [vmem:[%s5476_s0 + $0x18] sm:$0xff]  ;;  %v4848_v26 = vpack.c.bf16 %v271_v20, %v270_v19 }
  0x61   :  { %3840 = vmatpush3.bf16.msra.mxu0 %v4832_v16  ;;  %2877 = vmatprep.mubr.msk.f32.mxu0 %vm130_vm2, %v116_v22  ;;  %v118_v27 = vld [vmem:[%s5476_s0 + $0x20] sm:$0xff]  ;;  %v272_v28 = vld [vmem:[#allocation6 + $0x40] sm:$0xff]  ;;  %v273_v29 = vld [vmem:[#allocation6 + $0x48] sm:$0xff]  ;;  %v4860_v31 = vpack.c.bf16 %v301_v24, %v300_v23 }
  0x62   :  { %3819 = vmatpush3.bf16.msra.mxu1 %v4818_v7  ;;  %3841 = vmatprep.subr.bf16.mxu0 %v4670_v0  ;;  %v119_v30 = vld [vmem:[%s5476_s0 + $0x28] sm:$0xff]  ;;  %v120_v32 = vld [vmem:[%s5476_s0 + $0x30] sm:$0xff]  ;;  %v302_v33 = vld [vmem:[#allocation8 + $0x30] sm:$0xff]  ;;  %v4867_v35 = vpack.c.bf16 %v273_v29, %v272_v28 }
  0x63   :  { %3820 = vmatprep.subr.bf16.mxu1 %v4670_v0  ;;  %v303_v34 = vld [vmem:[#allocation8 + $0x38] sm:$0xff]  ;;  %v274_v36 = vld [vmem:[#allocation6 + $0x50] sm:$0xff]  ;;  %v304_v40 = vld [vmem:[#allocation8 + $0x40] sm:$0xff] }
  0x64   :  { %2878 = vmatmul.mubr.msk.f32.gmra.mrb[2].mxu0 %vm130_vm2, %v117_v25  ;;  %v275_v37 = vld [vmem:[#allocation6 + $0x58] sm:$0xff]  ;;  %v121_v38 = vld [vmem:[%s5476_s0 + $0x38] sm:$0xff]  ;;  %v4876_v39 = vpack.c.bf16 %v303_v34, %v302_v33  ;;  %v305_v41 = vld [vmem:[#allocation8 + $0x48] sm:$0xff] }
  0x65   :  { %2880 = vmatprep.mubr.msk.f32.mxu0 %vm130_vm2, %v118_v27  ;;  %3843 = vmatpush3.bf16.msra.mxu0 %v4837_v21  ;;  %v4880_v42 = vpack.c.bf16 %v275_v37, %v274_v36  ;;  %v276_v43 = vld [vmem:[#allocation6 + $0x60] sm:$0xff]  ;;  %v277_v44 = vld [vmem:[#allocation6 + $0x68] sm:$0xff]  ;;  %v4887_v45 = vpack.c.bf16 %v305_v41, %v304_v40  ;;  %v306_v46 = vld [vmem:[#allocation8 + $0x50] sm:$0xff] }
  0x66   :  { %3822 = vmatpush3.bf16.msra.mxu1 %v4829_v15  ;;  %3844 = vmatprep.subr.bf16.mxu0 %v4670_v0  ;;  %v307_v47 = vld [vmem:[#allocation8 + $0x58] sm:$0xff]  ;;  %v4891_v48 = vpack.c.bf16 %v277_v44, %v276_v43  ;;  %v278_v49 = vld [vmem:[#allocation6 + $0x70] sm:$0xff]  ;;  %v308_v52 = vld [vmem:[#allocation8 + $0x60] sm:$0xff] }
  0x67   :  { %3823 = vmatprep.subr.bf16.mxu1 %v4670_v0  ;;  %v279_v50 = vld [vmem:[#allocation6 + $0x78] sm:$0xff]  ;;  %v4895_v51 = vpack.c.bf16 %v307_v47, %v306_v46  ;;  %v309_v53 = vld [vmem:[#allocation8 + $0x68] sm:$0xff]  ;;  %v281_v56 = vld [vmem:[%s5480_s4 + $0x8] sm:$0xff] }
  0x68   :  { %2881 = vmatmul.mubr.msk.f32.gmra.mrb[4].mxu0 %vm130_vm2, %v119_v30  ;;  %v4899_v54 = vpack.c.bf16 %v279_v50, %v278_v49  ;;  %v280_v55 = vld [vmem:[%s5480_s4] sm:$0xff]  ;;  %v4909_v57 = vpack.c.bf16 %v309_v53, %v308_v52  ;;  %v310_v58 = vld [vmem:[#allocation8 + $0x70] sm:$0xff]  ;;  %v282_v61 = vld [vmem:[%s5480_s4 + $0x10] sm:$0xff] }
  0x69   :  { %2883 = vmatprep.mubr.msk.f32.mxu0 %vm130_vm2, %v120_v32  ;;  %3846 = vmatpush3.bf16.msra.mxu0 %v4860_v31  ;;  %v311_v59 = vld [vmem:[#allocation8 + $0x78] sm:$0xff]  ;;  %v4913_v60 = vpack.c.bf16 %v281_v56, %v280_v55  ;;  %v283_v62 = vld [vmem:[%s5480_s4 + $0x18] sm:$0xff]  ;;  %v285_v4 = vld [vmem:[%s5480_s4 + $0x28] sm:$0xff] }
  0x6a   :  { %3825 = vmatpush3.bf16.msra.mxu1 %v4848_v26  ;;  %3847 = vmatprep.subr.bf16.mxu0 %v4670_v0  ;;  %v4923_v63 = vpack.c.bf16 %v311_v59, %v310_v58  ;;  %v4928_v2 = vpack.c.bf16 %v283_v62, %v282_v61  ;;  %v284_v3 = vld [vmem:[%s5480_s4 + $0x20] sm:$0xff]  ;;  %v286_v8 = vld [vmem:[%s5480_s4 + $0x30] sm:$0xff]  ;;  %v287_v9 = vld [vmem:[%s5480_s4 + $0x38] sm:$0xff] }
  0x6b   :  { %3826 = vmatprep.subr.bf16.mxu1 %v4670_v0  ;;  %v4942_v6 = vpack.c.bf16 %v285_v4, %v284_v3  ;;  %v4957_v10 = vpack.c.bf16 %v287_v9, %v286_v8  ;;  %v288_v11 = vld [vmem:[%s5480_s4 + $0x40] sm:$0xff]  ;;  %v289_v12 = vld [vmem:[%s5480_s4 + $0x48] sm:$0xff]  ;;  %v290_v14 = vld [vmem:[%s5480_s4 + $0x50] sm:$0xff] }
  0x6c   :  { %2884 = vmatmul.mubr.msk.f32.gmra.mrb[6].mxu0 %vm130_vm2, %v121_v38  ;;  %v4982_v13 = vpack.c.bf16 %v289_v12, %v288_v11  ;;  %v291_v17 = vld [vmem:[%s5480_s4 + $0x58] sm:$0xff]  ;;  %v292_v19 = vld [vmem:[%s5480_s4 + $0x60] sm:$0xff]  ;;  %v293_v20 = vld [vmem:[%s5480_s4 + $0x68] sm:$0xff] }
  0x6d   :  { %2953 = vmatprep.mubr.msk.f32.mxu0 %vm4671_vm0, %v4672_v1  ;;  %3849 = vmatpush3.bf16.msra.mxu0 %v4876_v39  ;;  %v4992_v18 = vpack.c.bf16 %v291_v17, %v290_v14  ;;  %v5002_v22 = vpack.c.bf16 %v293_v20, %v292_v19  ;;  %v294_v23 = vld [vmem:[%s5480_s4 + $0x70] sm:$0xff]  ;;  %v295_v24 = vld [vmem:[%s5480_s4 + $0x78] sm:$0xff]  ;;  %v2394_v27 = vld [vmem:[%s5479_s3] ss:$0 sm:$0xff] }
  0x6e   :  { %3828 = vmatpush3.bf16.msra.mxu1 %v4867_v35  ;;  %3850 = vmatprep.subr.bf16.mxu0 %v4670_v0  ;;  %v5011_v25 = vpack.c.bf16 %v295_v24, %v294_v23  ;;  %v5070_v59 = vld [vmem:[%s5482_s6] ss:$0 sm:$0xff] }
  0x6f   :  { %3829 = vmatprep.subr.bf16.mxu1 %v4670_v0 }
  0x71   :  { %3852 = vmatpush3.bf16.msra.mxu0 %v4887_v45 }
  0x72   :  { %3831 = vmatpush3.bf16.msra.mxu1 %v4880_v42  ;;  %3853 = vmatprep.subr.bf16.mxu0 %v4670_v0 }
  0x73   :  { %3832 = vmatprep.subr.bf16.mxu1 %v4670_v0 }
  0x75   :  { %3855 = vmatpush3.bf16.msra.mxu0 %v4895_v51 }
  0x76   :  { %3834 = vmatpush3.bf16.msra.mxu1 %v4891_v48  ;;  %3856 = vmatprep.subr.bf16.mxu0 %v4670_v0 }
  0x77   :  { %3835 = vmatprep.subr.bf16.mxu1 %v4670_v0 }
  0x79   :  { %3858 = vmatpush3.bf16.msra.mxu0 %v4909_v57 }
  0x7a   :  { %3837 = vmatpush3.bf16.msra.mxu1 %v4899_v54  ;;  %3859 = vmatprep.subr.bf16.mxu0 %v4670_v0 }
  0x7b   :  { %3862 = vmatprep.subr.bf16.mxu1 %v4670_v0 }
  0x7d   :  { %2919 = vmatmul.mubr.f32.vlgmr.msra.gmra.mrb[0].mxu1 %v4672_v1  ;;  %3861 = vmatpush3.bf16.msra.mxu0 %v4923_v63 }
  0x7e   :  { %3864 = vmatpush3.bf16.msra.mxu1 %v4913_v60  ;;  %2988 = vmatprep.mubr.msk.f32.mxu1 %vm4671_vm0, %v4672_v1 }
  0x7f   :  { %3865 = vmatprep.subr.bf16.mxu1 %v4670_v0  ;;  %3886 = vmatprep.subr.bf16.mxu0 %v4670_v0 }
  0x80   :  { %2954 = vmatmul.mubr.f32.vlgmr.msra.gmra.mrb[8].mxu0 %v4672_v1 }
  0x81   :  { %3888 = vmatpush3.bf16.msra.mxu0 %v4815_v5  ;;  %3023 = vmatprep.mubr.msk.f32.mxu0 %vm4671_vm0, %v4672_v1 }
  0x82   :  { %3867 = vmatpush3.bf16.msra.mxu1 %v4928_v2  ;;  %3889 = vmatprep.subr.bf16.mxu0 %v4670_v0 }
  0x83   :  { %3868 = vmatprep.subr.bf16.mxu1 %v4670_v0 }
  0x85   :  { %3891 = vmatpush3.bf16.msra.mxu0 %v4818_v7 }
  0x86   :  { %3870 = vmatpush3.bf16.msra.mxu1 %v4942_v6  ;;  %3892 = vmatprep.subr.bf16.mxu0 %v4670_v0 }
  0x87   :  { %3871 = vmatprep.subr.bf16.mxu1 %v4670_v0 }
  0x89   :  { %3894 = vmatpush3.bf16.msra.mxu0 %v4829_v15 }
  0x8a   :  { %3873 = vmatpush3.bf16.msra.mxu1 %v4957_v10  ;;  %3895 = vmatprep.subr.bf16.mxu0 %v4670_v0 }
  0x8b   :  { %3874 = vmatprep.subr.bf16.mxu1 %v4670_v0 }
  0x8d   :  { %3897 = vmatpush3.bf16.msra.mxu0 %v4848_v26 }
  0x8e   :  { %3898 = vmatprep.subr.bf16.mxu0 %v4670_v0  ;;  %3876 = vmatpush3.bf16.msra.mxu1 %v4982_v13 }
  0x8f   :  { %3877 = vmatprep.subr.bf16.mxu1 %v4670_v0 }
  0x91   :  { %3900 = vmatpush3.bf16.msra.mxu0 %v4867_v35 }
  0x92   :  { %3901 = vmatprep.subr.bf16.mxu0 %v4670_v0  ;;  %3879 = vmatpush3.bf16.msra.mxu1 %v4992_v18 }
  0x93   :  { %3880 = vmatprep.subr.bf16.mxu1 %v4670_v0 }
  0x95   :  { %3903 = vmatpush3.bf16.msra.mxu0 %v4880_v42 }
  0x96   :  { %3904 = vmatprep.subr.bf16.mxu0 %v4670_v0  ;;  %3882 = vmatpush3.bf16.msra.mxu1 %v5002_v22 }
  0x97   :  { %3883 = vmatprep.subr.bf16.mxu1 %v4670_v0 }
  0x99   :  { %3906 = vmatpush3.bf16.msra.mxu0 %v4891_v48 }
  0x9a   :  { %3907 = vmatprep.subr.bf16.mxu0 %v4670_v0  ;;  %3885 = vmatpush3.bf16.msra.mxu1 %v5011_v25 }
  0x9b   :  { %3910 = vmatprep.subr.bf16.mxu1 %v4670_v0 }
  0x9d   :  { %3909 = vmatpush3.bf16.msra.mxu0 %v4899_v54 }
  0x9e   :  { %3934 = vmatprep.subr.bf16.mxu0 %v4670_v0 }
 0x133   :  { %v2876_v28 = vpop.f32.mrb[0].mxu0 }
 0x134   :  { %v231_v29 = vadd.f32 %v2876_v28, %v2394_v27  ;;  %v225_v30 = vpop.f32.mrb[1].mxu0 }
 0x135   :  { %v226_v49 = vadd.f32 %v2394_v27, %v225_v30 }
 0x137   :  { %v2879_v32 = vpop.f32.mrb[2].mxu0 }
 0x138   :  { %v5019_v33 = vadd.f32 %v2879_v32, %v2394_v27  ;;  %v235_v34 = vpop.f32.mrb[3].mxu0 }
 0x139   :  { %v5021_v36 = vadd.f32 %v2394_v27, %v235_v34 }
 0x13b   :  { %v2882_v37 = vpop.f32.mrb[4].mxu0 }
 0x13c   :  { %v5023_v38 = vadd.f32 %v2882_v37, %v2394_v27  ;;  %v245_v40 = vpop.f32.mrb[5].mxu0 }
 0x13d   :  { %v5025_v41 = vadd.f32 %v2394_v27, %v245_v40 }
 0x13f   :  { %v2885_v43 = vpop.f32.mrb[6].mxu0 }
 0x140   :  { %v5027_v44 = vadd.f32 %v2885_v43, %v2394_v27  ;;  %v255_v46 = vpop.f32.mrb[7].mxu0 }
 0x141   :  { %v5029_v47 = vadd.f32 %v2394_v27, %v255_v46 }
 0x150   :  { %v380_v50 = vpop.f32.mrb[0].mxu1 }
 0x151   :  { %v384_v52 = vadd.f32 %v380_v50, %v226_v49  ;;  %v2920_v53 = vpop.f32.mrb[1].mxu1 }
 0x153   :  { %4466 = vtanh.f32 %v384_v52  ;;  %v455_v55 = vpop.f32.mrb[8].mxu0 }
 0x154   :  { %v2955_v56 = vpop.f32.mrb[9].mxu0 }
 0x15d   :  { %v4467_v58 = vpop.eup %4466 }
 0x15e   :  { %2989 = vmatmul.mubr.f32.vlgmr.msra.gmra.mrb[2].mxu1 %v4467_v58  ;;  %3024 = vmatmul.mubr.f32.vlgmr.msra.gmra.mrb[10].mxu0 %v4467_v58 }
 0x15f   :  { %3936 = vmatpush3.bf16.msra.mxu0 %v4913_v60  ;;  %3912 = vmatpush3.bf16.msra.mxu1 %v4832_v16 }
 0x160   :  { %3937 = vmatprep.subr.bf16.mxu0 %v4670_v0  ;;  %3913 = vmatprep.subr.bf16.mxu1 %v4670_v0 }
 0x161   :  { %3093 = vmatprep.mubr.msk.f32.mxu0 %vm4671_vm0, %v4672_v1  ;;  %3058 = vmatprep.mubr.msk.f32.mxu1 %vm4671_vm0, %v4672_v1 }
 0x163   :  { %3939 = vmatpush3.bf16.msra.mxu0 %v4928_v2  ;;  %3915 = vmatpush3.bf16.msra.mxu1 %v4837_v21 }
 0x164   :  { %3940 = vmatprep.subr.bf16.mxu0 %v4670_v0  ;;  %3916 = vmatprep.subr.bf16.mxu1 %v4670_v0 }
 0x167   :  { %3942 = vmatpush3.bf16.msra.mxu0 %v4942_v6  ;;  %3918 = vmatpush3.bf16.msra.mxu1 %v4860_v31 }
 0x168   :  { %3943 = vmatprep.subr.bf16.mxu0 %v4670_v0  ;;  %3919 = vmatprep.subr.bf16.mxu1 %v4670_v0 }
 0x16b   :  { %3945 = vmatpush3.bf16.msra.mxu0 %v4957_v10  ;;  %3921 = vmatpush3.bf16.msra.mxu1 %v4876_v39 }
 0x16c   :  { %3946 = vmatprep.subr.bf16.mxu0 %v4670_v0  ;;  %3922 = vmatprep.subr.bf16.mxu1 %v4670_v0 }
 0x16f   :  { %3948 = vmatpush3.bf16.msra.mxu0 %v4982_v13  ;;  %3924 = vmatpush3.bf16.msra.mxu1 %v4887_v45 }
 0x170   :  { %3949 = vmatprep.subr.bf16.mxu0 %v4670_v0  ;;  %3925 = vmatprep.subr.bf16.mxu1 %v4670_v0 }
 0x173   :  { %3951 = vmatpush3.bf16.msra.mxu0 %v4992_v18  ;;  %3927 = vmatpush3.bf16.msra.mxu1 %v4895_v51 }
 0x174   :  { %3952 = vmatprep.subr.bf16.mxu0 %v4670_v0  ;;  %3928 = vmatprep.subr.bf16.mxu1 %v4670_v0 }
 0x177   :  { %3954 = vmatpush3.bf16.msra.mxu0 %v5002_v22  ;;  %3930 = vmatpush3.bf16.msra.mxu1 %v4909_v57 }
 0x178   :  { %3955 = vmatprep.subr.bf16.mxu0 %v4670_v0  ;;  %3931 = vmatprep.subr.bf16.mxu1 %v4670_v0 }
 0x17b   :  { %3957 = vmatpush3.bf16.msra.mxu0 %v5011_v25  ;;  %3933 = vmatpush3.bf16.msra.mxu1 %v4923_v63 }
 0x17c   :  { %3958 = vmatprep.subr.bf16.mxu1 %v4670_v0  ;;  %3982 = vmatprep.subr.bf16.mxu0 %v4670_v0 }
 0x231   :  { %v525_v61 = vpop.f32.mrb[2].mxu1  ;;  %v606_v62 = vpop.f32.mrb[10].mxu0 }
 0x232   :  { %v526_v3 = vadd.f32 %v525_v61, %v455_v55  ;;  %v610_v4 = vadd.f32 %v606_v62, %v231_v29  ;;  %v2990_v8 = vpop.f32.mrb[3].mxu1  ;;  %v3025_v9 = vpop.f32.mrb[11].mxu0 }
 0x234   :  { %v535_v11 = vadd.f32 %v5070_v59, %v526_v3  ;;  %4468 = vtanh.f32 %v610_v4 }
 0x236   :  { %4470 = vtanh.f32 %v535_v11 }
 0x23e   :  { %v4469_v12 = vpop.eup %4468 }
 0x23f   :  { %3094 = vmatmul.mubr.f32.vlgmr.msra.gmra.mrb[12].mxu0 %v4469_v12 }
 0x240   :  { %v5073_v14 = vpop.eup %4470  ;;  %3984 = vmatpush3.bf16.msra.mxu0 %v4832_v16  ;;  %3163 = vmatprep.mubr.msk.f32.mxu0 %vm4671_vm0, %v4672_v1 }
 0x241   :  { %538 = vst [vmem:[#allocation12] sm:$0xff] %v5073_v14  ;;  %3059 = vmatmul.mubr.f32.vlgmr.msra.gmra.mrb[4].mxu1 %v5073_v14  ;;  %3985 = vmatprep.subr.bf16.mxu0 %v4670_v0 }
 0x242   :  { %3960 = vmatpush3.bf16.msra.mxu1 %v4815_v5  ;;  %3128 = vmatprep.mubr.msk.f32.mxu1 %vm4671_vm0, %v4672_v1 }
 0x243   :  { %3961 = vmatprep.subr.bf16.mxu1 %v4670_v0 }
 0x244   :  { %3987 = vmatpush3.bf16.msra.mxu0 %v4837_v21 }
 0x245   :  { %3988 = vmatprep.subr.bf16.mxu0 %v4670_v0 }
 0x246   :  { %3963 = vmatpush3.bf16.msra.mxu1 %v4818_v7 }
 0x247   :  { %3964 = vmatprep.subr.bf16.mxu1 %v4670_v0 }
 0x248   :  { %3990 = vmatpush3.bf16.msra.mxu0 %v4860_v31 }
 0x249   :  { %3991 = vmatprep.subr.bf16.mxu0 %v4670_v0 }
 0x24a   :  { %3966 = vmatpush3.bf16.msra.mxu1 %v4829_v15 }
 0x24b   :  { %3967 = vmatprep.subr.bf16.mxu1 %v4670_v0 }
 0x24c   :  { %3993 = vmatpush3.bf16.msra.mxu0 %v4876_v39 }
 0x24d   :  { %3994 = vmatprep.subr.bf16.mxu0 %v4670_v0 }
 0x24e   :  { %3969 = vmatpush3.bf16.msra.mxu1 %v4848_v26 }
 0x24f   :  { %3970 = vmatprep.subr.bf16.mxu1 %v4670_v0 }
 0x250   :  { %3996 = vmatpush3.bf16.msra.mxu0 %v4887_v45 }
 0x251   :  { %3997 = vmatprep.subr.bf16.mxu0 %v4670_v0 }
 0x252   :  { %3972 = vmatpush3.bf16.msra.mxu1 %v4867_v35 }
 0x253   :  { %3973 = vmatprep.subr.bf16.mxu1 %v4670_v0 }
 0x254   :  { %3999 = vmatpush3.bf16.msra.mxu0 %v4895_v51 }
 0x255   :  { %4000 = vmatprep.subr.bf16.mxu0 %v4670_v0 }
 0x256   :  { %3975 = vmatpush3.bf16.msra.mxu1 %v4880_v42 }
 0x257   :  { %3976 = vmatprep.subr.bf16.mxu1 %v4670_v0 }
 0x258   :  { %4002 = vmatpush3.bf16.msra.mxu0 %v4909_v57 }
 0x259   :  { %4003 = vmatprep.subr.bf16.mxu0 %v4670_v0 }
 0x25a   :  { %3978 = vmatpush3.bf16.msra.mxu1 %v4891_v48 }
 0x25b   :  { %3979 = vmatprep.subr.bf16.mxu1 %v4670_v0 }
 0x25c   :  { %4005 = vmatpush3.bf16.msra.mxu0 %v4923_v63 }
 0x25d   :  { %4030 = vmatprep.subr.bf16.mxu0 %v4670_v0 }
 0x25e   :  { %3981 = vmatpush3.bf16.msra.mxu1 %v4899_v54 }
 0x25f   :  { %4006 = vmatprep.subr.bf16.mxu1 %v4670_v0 }
 0x261   :  { %3129 = vmatmul.mubr.f32.vlgmr.msra.gmra.mrb[6].mxu1 %v4469_v12 }
 0x262   :  { %4008 = vmatpush3.bf16.msra.mxu1 %v4913_v60  ;;  %3198 = vmatprep.mubr.msk.f32.mxu1 %vm4671_vm0, %v4672_v1 }
 0x263   :  { %4009 = vmatprep.subr.bf16.mxu1 %v4670_v0 }
 0x266   :  { %4011 = vmatpush3.bf16.msra.mxu1 %v4928_v2 }
 0x267   :  { %4012 = vmatprep.subr.bf16.mxu1 %v4670_v0 }
 0x26a   :  { %4014 = vmatpush3.bf16.msra.mxu1 %v4942_v6 }
 0x26b   :  { %4015 = vmatprep.subr.bf16.mxu1 %v4670_v0 }
 0x26e   :  { %4017 = vmatpush3.bf16.msra.mxu1 %v4957_v10 }
 0x26f   :  { %4018 = vmatprep.subr.bf16.mxu1 %v4670_v0 }
 0x272   :  { %4020 = vmatpush3.bf16.msra.mxu1 %v4982_v13 }
 0x273   :  { %4021 = vmatprep.subr.bf16.mxu1 %v4670_v0 }
 0x276   :  { %4023 = vmatpush3.bf16.msra.mxu1 %v4992_v18 }
 0x277   :  { %4024 = vmatprep.subr.bf16.mxu1 %v4670_v0 }
 0x27a   :  { %4026 = vmatpush3.bf16.msra.mxu1 %v5002_v22 }
 0x27b   :  { %4027 = vmatprep.subr.bf16.mxu1 %v4670_v0 }
 0x27e   :  { %4029 = vmatpush3.bf16.msra.mxu1 %v5011_v25 }
 0x27f   :  { %4054 = vmatprep.subr.bf16.mxu1 %v4670_v0 }
 0x312   :  { %v750_v17 = vpop.f32.mrb[12].mxu0 }
 0x313   :  { %v3095_v19 = vpop.f32.mrb[13].mxu0 }
 0x314   :  { %v680_v20 = vpop.f32.mrb[4].mxu1 }
 0x315   :  { %v751_v23 = vadd.f32 %v750_v17, %v680_v20  ;;  %v3060_v24 = vpop.f32.mrb[5].mxu1 }
 0x317   :  { %v754_v27 = vadd.f32 %v5070_v59, %v751_v23 }
 0x319   :  { %4472 = vtanh.f32 %v754_v27 }
 0x323   :  { %v5132_v28 = vpop.eup %4472 }
 0x324   :  { %758 = vst [vmem:[#allocation12 + $0x8] sm:$0xff] %v5132_v28  ;;  %3164 = vmatmul.mubr.f32.vlgmr.msra.gmra.mrb[14].mxu0 %v5132_v28 }
 0x325   :  { %4032 = vmatpush3.bf16.msra.mxu0 %v4815_v5  ;;  %3233 = vmatprep.mubr.msk.f32.mxu0 %vm4671_vm0, %v4672_v1 }
 0x326   :  { %4033 = vmatprep.subr.bf16.mxu0 %v4670_v0 }
 0x329   :  { %4035 = vmatpush3.bf16.msra.mxu0 %v4818_v7 }
 0x32a   :  { %4036 = vmatprep.subr.bf16.mxu0 %v4670_v0 }
 0x32d   :  { %4038 = vmatpush3.bf16.msra.mxu0 %v4829_v15 }
 0x32e   :  { %4039 = vmatprep.subr.bf16.mxu0 %v4670_v0 }
 0x331   :  { %4041 = vmatpush3.bf16.msra.mxu0 %v4848_v26 }
 0x332   :  { %4042 = vmatprep.subr.bf16.mxu0 %v4670_v0 }
 0x334   :  { %v826_v29 = vpop.f32.mrb[6].mxu1 }
 0x335   :  { %v830_v30 = vadd.f32 %v826_v29, %v5021_v36  ;;  %v3130_v32 = vpop.f32.mrb[7].mxu1  ;;  %4044 = vmatpush3.bf16.msra.mxu0 %v4867_v35 }
 0x336   :  { %4045 = vmatprep.subr.bf16.mxu0 %v4670_v0 }
 0x337   :  { %4474 = vtanh.f32 %v830_v30 }
 0x339   :  { %4047 = vmatpush3.bf16.msra.mxu0 %v4880_v42 }
 0x33a   :  { %4048 = vmatprep.subr.bf16.mxu0 %v4670_v0 }
 0x33d   :  { %4050 = vmatpush3.bf16.msra.mxu0 %v4891_v48 }
 0x33e   :  { %4051 = vmatprep.subr.bf16.mxu0 %v4670_v0 }
 0x341   :  { %v4475_v34 = vpop.eup %4474  ;;  %4053 = vmatpush3.bf16.msra.mxu0 %v4899_v54 }
 0x342   :  { %3199 = vmatmul.mubr.f32.vlgmr.msra.gmra.mrb[8].mxu1 %v4475_v34  ;;  %4078 = vmatprep.subr.bf16.mxu0 %v4670_v0 }
 0x343   :  { %4056 = vmatpush3.bf16.msra.mxu1 %v4832_v16  ;;  %3268 = vmatprep.mubr.msk.f32.mxu1 %vm4671_vm0, %v4672_v1 }
 0x344   :  { %3234 = vmatmul.mubr.f32.vlgmr.msra.gmra.mrb[16].mxu0 %v4475_v34  ;;  %4057 = vmatprep.subr.bf16.mxu1 %v4670_v0 }
 0x345   :  { %4080 = vmatpush3.bf16.msra.mxu0 %v4913_v60  ;;  %3303 = vmatprep.mubr.msk.f32.mxu0 %vm4671_vm0, %v4672_v1 }
 0x346   :  { %4081 = vmatprep.subr.bf16.mxu0 %v4670_v0 }
 0x347   :  { %4059 = vmatpush3.bf16.msra.mxu1 %v4837_v21 }
 0x348   :  { %4060 = vmatprep.subr.bf16.mxu1 %v4670_v0 }
 0x349   :  { %4083 = vmatpush3.bf16.msra.mxu0 %v4928_v2 }
 0x34a   :  { %4084 = vmatprep.subr.bf16.mxu0 %v4670_v0 }
 0x34b   :  { %4062 = vmatpush3.bf16.msra.mxu1 %v4860_v31 }
 0x34c   :  { %4063 = vmatprep.subr.bf16.mxu1 %v4670_v0 }
 0x34d   :  { %4086 = vmatpush3.bf16.msra.mxu0 %v4942_v6 }
 0x34e   :  { %4087 = vmatprep.subr.bf16.mxu0 %v4670_v0 }
 0x34f   :  { %4065 = vmatpush3.bf16.msra.mxu1 %v4876_v39 }
 0x350   :  { %4066 = vmatprep.subr.bf16.mxu1 %v4670_v0 }
 0x351   :  { %4089 = vmatpush3.bf16.msra.mxu0 %v4957_v10 }
 0x352   :  { %4090 = vmatprep.subr.bf16.mxu0 %v4670_v0 }
 0x353   :  { %4068 = vmatpush3.bf16.msra.mxu1 %v4887_v45 }
 0x354   :  { %4069 = vmatprep.subr.bf16.mxu1 %v4670_v0 }
 0x355   :  { %4092 = vmatpush3.bf16.msra.mxu0 %v4982_v13 }
 0x356   :  { %4093 = vmatprep.subr.bf16.mxu0 %v4670_v0 }
 0x357   :  { %4071 = vmatpush3.bf16.msra.mxu1 %v4895_v51 }
 0x358   :  { %4072 = vmatprep.subr.bf16.mxu1 %v4670_v0 }
 0x359   :  { %4095 = vmatpush3.bf16.msra.mxu0 %v4992_v18 }
 0x35a   :  { %4096 = vmatprep.subr.bf16.mxu0 %v4670_v0 }
 0x35b   :  { %4074 = vmatpush3.bf16.msra.mxu1 %v4909_v57 }
 0x35c   :  { %4075 = vmatprep.subr.bf16.mxu1 %v4670_v0 }
 0x35d   :  { %4098 = vmatpush3.bf16.msra.mxu0 %v5002_v22 }
 0x35e   :  { %4099 = vmatprep.subr.bf16.mxu0 %v4670_v0 }
 0x35f   :  { %4077 = vmatpush3.bf16.msra.mxu1 %v4923_v63 }
 0x360   :  { %4102 = vmatprep.subr.bf16.mxu1 %v4670_v0 }
 0x361   :  { %4101 = vmatpush3.bf16.msra.mxu0 %v5011_v25 }
 0x362   :  { %4126 = vmatprep.subr.bf16.mxu0 %v4670_v0 }
 0x3f7   :  { %v900_v36 = vpop.f32.mrb[14].mxu0 }
 0x3f8   :  { %v3165_v37 = vpop.f32.mrb[15].mxu0 }
 0x415   :  { %v970_v40 = vpop.f32.mrb[8].mxu1 }
 0x416   :  { %v971_v43 = vadd.f32 %v970_v40, %v900_v36  ;;  %v3200_v46 = vpop.f32.mrb[9].mxu1 }
 0x417   :  { %v1046_v49 = vpop.f32.mrb[16].mxu0 }
 0x418   :  { %v974_v50 = vadd.f32 %v5070_v59, %v971_v43  ;;  %v1050_v52 = vadd.f32 %v1046_v49, %v5019_v33  ;;  %v3235_v53 = vpop.f32.mrb[17].mxu0 }
 0x41a   :  { %4476 = vtanh.f32 %v974_v50 }
 0x41b   :  { %4478 = vtanh.f32 %v1050_v52 }
 0x424   :  { %v5193_v55 = vpop.eup %4476 }
 0x425   :  { %v4479_v56 = vpop.eup %4478  ;;  %978 = vst [vmem:[#allocation12 + $0x10] sm:$0xff] %v5193_v55  ;;  %3269 = vmatmul.mubr.f32.vlgmr.msra.gmra.mrb[10].mxu1 %v5193_v55 }
 0x426   :  { %3304 = vmatmul.mubr.f32.vlgmr.msra.gmra.mrb[18].mxu0 %v4479_v56  ;;  %4104 = vmatpush3.bf16.msra.mxu1 %v4815_v5 }
 0x427   :  { %4105 = vmatprep.subr.bf16.mxu1 %v4670_v0  ;;  %3338 = vmatprep.mubr.msk.f32.mxu1 %vm4671_vm0, %v4672_v1 }
 0x428   :  { %4128 = vmatpush3.bf16.msra.mxu0 %v4832_v16  ;;  %3373 = vmatprep.mubr.msk.f32.mxu0 %vm4671_vm0, %v4672_v1 }
 0x429   :  { %4129 = vmatprep.subr.bf16.mxu0 %v4670_v0 }
 0x42a   :  { %4107 = vmatpush3.bf16.msra.mxu1 %v4818_v7 }
 0x42b   :  { %4108 = vmatprep.subr.bf16.mxu1 %v4670_v0 }
 0x42c   :  { %4131 = vmatpush3.bf16.msra.mxu0 %v4837_v21 }
 0x42d   :  { %4132 = vmatprep.subr.bf16.mxu0 %v4670_v0 }
 0x42e   :  { %4110 = vmatpush3.bf16.msra.mxu1 %v4829_v15 }
 0x42f   :  { %4111 = vmatprep.subr.bf16.mxu1 %v4670_v0 }
 0x430   :  { %4134 = vmatpush3.bf16.msra.mxu0 %v4860_v31 }
 0x431   :  { %4135 = vmatprep.subr.bf16.mxu0 %v4670_v0 }
 0x432   :  { %4113 = vmatpush3.bf16.msra.mxu1 %v4848_v26 }
 0x433   :  { %4114 = vmatprep.subr.bf16.mxu1 %v4670_v0 }
 0x434   :  { %4137 = vmatpush3.bf16.msra.mxu0 %v4876_v39 }
 0x435   :  { %4138 = vmatprep.subr.bf16.mxu0 %v4670_v0 }
 0x436   :  { %4116 = vmatpush3.bf16.msra.mxu1 %v4867_v35 }
 0x437   :  { %4117 = vmatprep.subr.bf16.mxu1 %v4670_v0 }
 0x438   :  { %4140 = vmatpush3.bf16.msra.mxu0 %v4887_v45 }
 0x439   :  { %4141 = vmatprep.subr.bf16.mxu0 %v4670_v0 }
 0x43a   :  { %4119 = vmatpush3.bf16.msra.mxu1 %v4880_v42 }
 0x43b   :  { %4120 = vmatprep.subr.bf16.mxu1 %v4670_v0 }
 0x43c   :  { %4143 = vmatpush3.bf16.msra.mxu0 %v4895_v51 }
 0x43d   :  { %4144 = vmatprep.subr.bf16.mxu0 %v4670_v0 }
 0x43e   :  { %4122 = vmatpush3.bf16.msra.mxu1 %v4891_v48 }
 0x43f   :  { %4123 = vmatprep.subr.bf16.mxu1 %v4670_v0 }
 0x440   :  { %4146 = vmatpush3.bf16.msra.mxu0 %v4909_v57 }
 0x441   :  { %4147 = vmatprep.subr.bf16.mxu0 %v4670_v0 }
 0x442   :  { %4125 = vmatpush3.bf16.msra.mxu1 %v4899_v54 }
 0x443   :  { %4150 = vmatprep.subr.bf16.mxu1 %v4670_v0 }
 0x444   :  { %4149 = vmatpush3.bf16.msra.mxu0 %v4923_v63 }
 0x445   :  { %3339 = vmatmul.mubr.f32.vlgmr.msra.gmra.mrb[12].mxu1 %v4479_v56  ;;  %4174 = vmatprep.subr.bf16.mxu0 %v4670_v0  ;;  %v2098_v56 = vld [vmem:[#allocation9 + $0x58] sm:$0xff] }
 0x446   :  { %4152 = vmatpush3.bf16.msra.mxu1 %v4913_v60  ;;  %3408 = vmatprep.mubr.msk.f32.mxu1 %vm4671_vm0, %v4672_v1 }
 0x447   :  { %4153 = vmatprep.subr.bf16.mxu1 %v4670_v0 }
 0x44a   :  { %4155 = vmatpush3.bf16.msra.mxu1 %v4928_v2 }
 0x44b   :  { %4156 = vmatprep.subr.bf16.mxu1 %v4670_v0 }
 0x44e   :  { %4158 = vmatpush3.bf16.msra.mxu1 %v4942_v6 }
 0x44f   :  { %4159 = vmatprep.subr.bf16.mxu1 %v4670_v0 }
 0x452   :  { %4161 = vmatpush3.bf16.msra.mxu1 %v4957_v10 }
 0x453   :  { %4162 = vmatprep.subr.bf16.mxu1 %v4670_v0 }
 0x456   :  { %4164 = vmatpush3.bf16.msra.mxu1 %v4982_v13 }
 0x457   :  { %4165 = vmatprep.subr.bf16.mxu1 %v4670_v0 }
 0x45a   :  { %4167 = vmatpush3.bf16.msra.mxu1 %v4992_v18 }
 0x45b   :  { %4168 = vmatprep.subr.bf16.mxu1 %v4670_v0 }
 0x45e   :  { %4170 = vmatpush3.bf16.msra.mxu1 %v5002_v22 }
 0x45f   :  { %4171 = vmatprep.subr.bf16.mxu1 %v4670_v0 }
 0x462   :  { %4173 = vmatpush3.bf16.msra.mxu1 %v5011_v25 }
 0x463   :  { %4198 = vmatprep.subr.bf16.mxu1 %v4670_v0 }
 0x4f8   :  { %v1120_v33 = vpop.f32.mrb[10].mxu1 }
 0x4f9   :  { %v1190_v58 = vpop.f32.mrb[18].mxu0  ;;  %v3270_v61 = vpop.f32.mrb[11].mxu1 }
 0x4fa   :  { %v1191_v62 = vadd.f32 %v1190_v58, %v1120_v33  ;;  %v3305_v3 = vpop.f32.mrb[19].mxu0  ;;  %v2099_v58 = vld [vmem:[#allocation9 + $0x60] sm:$0xff]  ;;  %v2100_v61 = vld [vmem:[#allocation9 + $0x68] sm:$0xff] }
 0x4fb   :  { %v2102_v3 = vld [vmem:[#allocation9 + $0x78] sm:$0xff] }
 0x4fc   :  { %v1194_v4 = vadd.f32 %v5070_v59, %v1191_v62  ;;  %v2101_v62 = vld [vmem:[#allocation9 + $0x70] sm:$0xff] }
 0x4fe   :  { %4480 = vtanh.f32 %v1194_v4  ;;  %v4418_v4 = vpack.c.bf16 %v2102_v3, %v2101_v62 }
 0x508   :  { %v5252_v8 = vpop.eup %4480 }
 0x509   :  { %1198 = vst [vmem:[#allocation12 + $0x18] sm:$0xff] %v5252_v8  ;;  %3374 = vmatmul.mubr.f32.vlgmr.msra.gmra.mrb[20].mxu0 %v5252_v8 }
 0x50a   :  { %4176 = vmatpush3.bf16.msra.mxu0 %v4815_v5  ;;  %3443 = vmatprep.mubr.msk.f32.mxu0 %vm4671_vm0, %v4672_v1 }
 0x50b   :  { %4177 = vmatprep.subr.bf16.mxu0 %v4670_v0 }
 0x50e   :  { %4179 = vmatpush3.bf16.msra.mxu0 %v4818_v7 }
 0x50f   :  { %4180 = vmatprep.subr.bf16.mxu0 %v4670_v0 }
 0x512   :  { %4182 = vmatpush3.bf16.msra.mxu0 %v4829_v15 }
 0x513   :  { %4183 = vmatprep.subr.bf16.mxu0 %v4670_v0 }
 0x516   :  { %4185 = vmatpush3.bf16.msra.mxu0 %v4848_v26 }
 0x517   :  { %4186 = vmatprep.subr.bf16.mxu0 %v4670_v0 }
 0x518   :  { %v1266_v9 = vpop.f32.mrb[12].mxu1 }
 0x519   :  { %v1270_v11 = vadd.f32 %v1266_v9, %v5025_v41  ;;  %v3340_v12 = vpop.f32.mrb[13].mxu1  ;;  %v2223_v9 = vld [vmem:[#allocation11] sm:$0xff] }
 0x51a   :  { %4188 = vmatpush3.bf16.msra.mxu0 %v4867_v35 }
 0x51b   :  { %4482 = vtanh.f32 %v1270_v11  ;;  %4189 = vmatprep.subr.bf16.mxu0 %v4670_v0  ;;  %v2224_v11 = vld [vmem:[#allocation11 + $0x8] sm:$0xff] }
 0x51c   :  { %v4422_v12 = vpack.c.bf16 %v2224_v11, %v2223_v9 }
 0x51e   :  { %4191 = vmatpush3.bf16.msra.mxu0 %v4880_v42 }
 0x51f   :  { %4192 = vmatprep.subr.bf16.mxu0 %v4670_v0 }
 0x522   :  { %4194 = vmatpush3.bf16.msra.mxu0 %v4891_v48 }
 0x523   :  { %4195 = vmatprep.subr.bf16.mxu0 %v4670_v0 }
 0x525   :  { %v4483_v17 = vpop.eup %4482 }
 0x526   :  { %4197 = vmatpush3.bf16.msra.mxu0 %v4899_v54  ;;  %3409 = vmatmul.mubr.f32.vlgmr.msra.gmra.mrb[14].mxu1 %v4483_v17 }
 0x527   :  { %4200 = vmatpush3.bf16.msra.mxu1 %v4832_v16  ;;  %4222 = vmatprep.subr.bf16.mxu0 %v4670_v0 }
 0x528   :  { %4201 = vmatprep.subr.bf16.mxu1 %v4670_v0  ;;  %3478 = vmatprep.mubr.msk.f32.mxu1 %vm4671_vm0, %v4672_v1 }
 0x529   :  { %3444 = vmatmul.mubr.f32.vlgmr.msra.gmra.mrb[22].mxu0 %v4483_v17  ;;  %v2225_v17 = vld [vmem:[#allocation11 + $0x10] sm:$0xff] }
 0x52a   :  { %4224 = vmatpush3.bf16.msra.mxu0 %v4913_v60  ;;  %3513 = vmatprep.mubr.msk.f32.mxu0 %vm4671_vm0, %v4672_v1 }
 0x52b   :  { %4203 = vmatpush3.bf16.msra.mxu1 %v4837_v21  ;;  %4225 = vmatprep.subr.bf16.mxu0 %v4670_v0 }
 0x52c   :  { %4204 = vmatprep.subr.bf16.mxu1 %v4670_v0 }
 0x52e   :  { %4227 = vmatpush3.bf16.msra.mxu0 %v4928_v2 }
 0x52f   :  { %4206 = vmatpush3.bf16.msra.mxu1 %v4860_v31  ;;  %4228 = vmatprep.subr.bf16.mxu0 %v4670_v0 }
 0x530   :  { %4207 = vmatprep.subr.bf16.mxu1 %v4670_v0 }
 0x532   :  { %4230 = vmatpush3.bf16.msra.mxu0 %v4942_v6 }
 0x533   :  { %4209 = vmatpush3.bf16.msra.mxu1 %v4876_v39  ;;  %4231 = vmatprep.subr.bf16.mxu0 %v4670_v0 }
 0x534   :  { %4210 = vmatprep.subr.bf16.mxu1 %v4670_v0 }
 0x536   :  { %4233 = vmatpush3.bf16.msra.mxu0 %v4957_v10 }
 0x537   :  { %4212 = vmatpush3.bf16.msra.mxu1 %v4887_v45  ;;  %4234 = vmatprep.subr.bf16.mxu0 %v4670_v0 }
 0x538   :  { %4213 = vmatprep.subr.bf16.mxu1 %v4670_v0 }
 0x53a   :  { %4236 = vmatpush3.bf16.msra.mxu0 %v4982_v13 }
 0x53b   :  { %4215 = vmatpush3.bf16.msra.mxu1 %v4895_v51  ;;  %4237 = vmatprep.subr.bf16.mxu0 %v4670_v0 }
 0x53c   :  { %4216 = vmatprep.subr.bf16.mxu1 %v4670_v0 }
 0x53e   :  { %4239 = vmatpush3.bf16.msra.mxu0 %v4992_v18 }
 0x53f   :  { %4218 = vmatpush3.bf16.msra.mxu1 %v4909_v57  ;;  %4240 = vmatprep.subr.bf16.mxu0 %v4670_v0 }
 0x540   :  { %4219 = vmatprep.subr.bf16.mxu1 %v4670_v0 }
 0x542   :  { %4242 = vmatpush3.bf16.msra.mxu0 %v5002_v22 }
 0x543   :  { %4221 = vmatpush3.bf16.msra.mxu1 %v4923_v63  ;;  %4243 = vmatprep.subr.bf16.mxu0 %v4670_v0 }
 0x544   :  { %4246 = vmatprep.subr.bf16.mxu1 %v4670_v0 }
 0x546   :  { %4245 = vmatpush3.bf16.msra.mxu0 %v5011_v25 }
 0x547   :  { %4270 = vmatprep.subr.bf16.mxu0 %v4670_v0 }
 0x5dc   :  { %v1340_v41 = vpop.f32.mrb[20].mxu0 }
 0x5dd   :  { %v3375_v19 = vpop.f32.mrb[21].mxu0 }
 0x5f9   :  { %v1410_v20 = vpop.f32.mrb[14].mxu1 }
 0x5fa   :  { %v1411_v23 = vadd.f32 %v1410_v20, %v1340_v41  ;;  %v3410_v24 = vpop.f32.mrb[15].mxu1  ;;  %v2226_v41 = vld [vmem:[#allocation11 + $0x18] sm:$0xff]  ;;  %v2228_v20 = vld [vmem:[#allocation11 + $0x28] sm:$0xff] }
 0x5fb   :  { %v4426_v19 = vpack.c.bf16 %v2226_v41, %v2225_v17 }
 0x5fc   :  { %v1414_v27 = vadd.f32 %v5070_v59, %v1411_v23  ;;  %v1486_v29 = vpop.f32.mrb[22].mxu0  ;;  %v2230_v23 = vld [vmem:[#allocation11 + $0x38] sm:$0xff] }
 0x5fd   :  { %v1490_v30 = vadd.f32 %v1486_v29, %v5023_v38  ;;  %v3445_v32 = vpop.f32.mrb[23].mxu0  ;;  %v2232_v29 = vld [vmem:[#allocation11 + $0x48] sm:$0xff] }
 0x5fe   :  { %4484 = vtanh.f32 %v1414_v27  ;;  %v2231_v27 = vld [vmem:[#allocation11 + $0x40] sm:$0xff]  ;;  %v2233_v32 = vld [vmem:[#allocation11 + $0x50] sm:$0xff] }
 0x5ff   :  { %4486 = vtanh.f32 %v1490_v30  ;;  %v4438_v30 = vpack.c.bf16 %v2232_v29, %v2231_v27 }
 0x608   :  { %v5313_v34 = vpop.eup %4484 }
 0x609   :  { %v4487_v36 = vpop.eup %4486  ;;  %1418 = vst [vmem:[#allocation12 + $0x20] sm:$0xff] %v5313_v34  ;;  %3479 = vmatmul.mubr.f32.vlgmr.msra.gmra.mrb[16].mxu1 %v5313_v34 }
 0x60a   :  { %3514 = vmatmul.mubr.f32.vlgmr.msra.gmra.mrb[24].mxu0 %v4487_v36  ;;  %4248 = vmatpush3.bf16.msra.mxu1 %v4815_v5 }
 0x60b   :  { %4249 = vmatprep.subr.bf16.mxu1 %v4670_v0  ;;  %3548 = vmatprep.mubr.msk.f32.mxu1 %vm4671_vm0, %v4672_v1 }
 0x60c   :  { %4272 = vmatpush3.bf16.msra.mxu0 %v4832_v16  ;;  %3583 = vmatprep.mubr.msk.f32.mxu0 %vm4671_vm0, %v4672_v1 }
 0x60d   :  { %4273 = vmatprep.subr.bf16.mxu0 %v4670_v0 }
 0x60e   :  { %4251 = vmatpush3.bf16.msra.mxu1 %v4818_v7 }
 0x60f   :  { %4252 = vmatprep.subr.bf16.mxu1 %v4670_v0 }
 0x610   :  { %4275 = vmatpush3.bf16.msra.mxu0 %v4837_v21 }
 0x611   :  { %4276 = vmatprep.subr.bf16.mxu0 %v4670_v0 }
 0x612   :  { %4254 = vmatpush3.bf16.msra.mxu1 %v4829_v15 }
 0x613   :  { %4255 = vmatprep.subr.bf16.mxu1 %v4670_v0 }
 0x614   :  { %4278 = vmatpush3.bf16.msra.mxu0 %v4860_v31 }
 0x615   :  { %4279 = vmatprep.subr.bf16.mxu0 %v4670_v0 }
 0x616   :  { %4257 = vmatpush3.bf16.msra.mxu1 %v4848_v26 }
 0x617   :  { %4258 = vmatprep.subr.bf16.mxu1 %v4670_v0 }
 0x618   :  { %4281 = vmatpush3.bf16.msra.mxu0 %v4876_v39 }
 0x619   :  { %4282 = vmatprep.subr.bf16.mxu0 %v4670_v0 }
 0x61a   :  { %4260 = vmatpush3.bf16.msra.mxu1 %v4867_v35 }
 0x61b   :  { %4261 = vmatprep.subr.bf16.mxu1 %v4670_v0 }
 0x61c   :  { %4284 = vmatpush3.bf16.msra.mxu0 %v4887_v45 }
 0x61d   :  { %4285 = vmatprep.subr.bf16.mxu0 %v4670_v0 }
 0x61e   :  { %4263 = vmatpush3.bf16.msra.mxu1 %v4880_v42 }
 0x61f   :  { %4264 = vmatprep.subr.bf16.mxu1 %v4670_v0 }
 0x620   :  { %4287 = vmatpush3.bf16.msra.mxu0 %v4895_v51 }
 0x621   :  { %4288 = vmatprep.subr.bf16.mxu0 %v4670_v0 }
 0x622   :  { %4266 = vmatpush3.bf16.msra.mxu1 %v4891_v48 }
 0x623   :  { %4267 = vmatprep.subr.bf16.mxu1 %v4670_v0 }
 0x624   :  { %4290 = vmatpush3.bf16.msra.mxu0 %v4909_v57 }
 0x625   :  { %4291 = vmatprep.subr.bf16.mxu0 %v4670_v0 }
 0x626   :  { %4269 = vmatpush3.bf16.msra.mxu1 %v4899_v54 }
 0x627   :  { %4294 = vmatprep.subr.bf16.mxu1 %v4670_v0 }
 0x628   :  { %4293 = vmatpush3.bf16.msra.mxu0 %v4923_v63 }
 0x629   :  { %3549 = vmatmul.mubr.f32.vlgmr.msra.gmra.mrb[18].mxu1 %v4487_v36  ;;  %4318 = vmatprep.subr.bf16.mxu0 %v4670_v0 }
 0x62a   :  { %4296 = vmatpush3.bf16.msra.mxu1 %v4913_v60  ;;  %3618 = vmatprep.mubr.msk.f32.mxu1 %vm4671_vm0, %v4672_v1 }
 0x62b   :  { %4297 = vmatprep.subr.bf16.mxu1 %v4670_v0 }
 0x62e   :  { %4299 = vmatpush3.bf16.msra.mxu1 %v4928_v2 }
 0x62f   :  { %4300 = vmatprep.subr.bf16.mxu1 %v4670_v0 }
 0x632   :  { %4302 = vmatpush3.bf16.msra.mxu1 %v4942_v6 }
 0x633   :  { %4303 = vmatprep.subr.bf16.mxu1 %v4670_v0 }
 0x636   :  { %4305 = vmatpush3.bf16.msra.mxu1 %v4957_v10 }
 0x637   :  { %4306 = vmatprep.subr.bf16.mxu1 %v4670_v0 }
 0x63a   :  { %4308 = vmatpush3.bf16.msra.mxu1 %v4982_v13 }
 0x63b   :  { %4309 = vmatprep.subr.bf16.mxu1 %v4670_v0 }
 0x63e   :  { %4311 = vmatpush3.bf16.msra.mxu1 %v4992_v18 }
 0x63f   :  { %4312 = vmatprep.subr.bf16.mxu1 %v4670_v0 }
 0x642   :  { %4314 = vmatpush3.bf16.msra.mxu1 %v5002_v22 }
 0x643   :  { %4315 = vmatprep.subr.bf16.mxu1 %v4670_v0 }
 0x646   :  { %4317 = vmatpush3.bf16.msra.mxu1 %v5011_v25 }
 0x647   :  { %4342 = vmatprep.subr.bf16.mxu1 %v4670_v0 }
 0x6dc   :  { %v1560_v38 = vpop.f32.mrb[16].mxu1 }
 0x6dd   :  { %v1630_v37 = vpop.f32.mrb[24].mxu0  ;;  %v3480_v40 = vpop.f32.mrb[17].mxu1 }
 0x6de   :  { %v1631_v43 = vadd.f32 %v1630_v37, %v1560_v38  ;;  %v3515_v46 = vpop.f32.mrb[25].mxu0  ;;  %v2235_v38 = vld [vmem:[#allocation11 + $0x60] sm:$0xff]  ;;  %v2236_v37 = vld [vmem:[#allocation11 + $0x68] sm:$0xff] }
 0x6df   :  { %v4446_v40 = vpack.c.bf16 %v2236_v37, %v2235_v38  ;;  %v2238_v46 = vld [vmem:[#allocation11 + $0x78] sm:$0xff] }
 0x6e0   :  { %v1634_v49 = vadd.f32 %v5070_v59, %v1631_v43  ;;  %v2237_v43 = vld [vmem:[#allocation11 + $0x70] sm:$0xff] }
 0x6e2   :  { %4488 = vtanh.f32 %v1634_v49  ;;  %v4450_v49 = vpack.c.bf16 %v2238_v46, %v2237_v43 }
 0x6ec   :  { %v5372_v50 = vpop.eup %4488 }
 0x6ed   :  { %1638 = vst [vmem:[#allocation12 + $0x28] sm:$0xff] %v5372_v50  ;;  %3584 = vmatmul.mubr.f32.vlgmr.msra.gmra.mrb[26].mxu0 %v5372_v50 }
 0x6ee   :  { %4320 = vmatpush3.bf16.msra.mxu0 %v4815_v5  ;;  %3653 = vmatprep.mubr.msk.f32.mxu0 %vm4671_vm0, %v4672_v1 }
 0x6ef   :  { %4321 = vmatprep.subr.bf16.mxu0 %v4670_v0 }
 0x6f2   :  { %4323 = vmatpush3.bf16.msra.mxu0 %v4818_v7 }
 0x6f3   :  { %4324 = vmatprep.subr.bf16.mxu0 %v4670_v0 }
 0x6f6   :  { %4326 = vmatpush3.bf16.msra.mxu0 %v4829_v15  ;;  %v2088_v15 = vld [vmem:[#allocation9 + $0x8] sm:$0xff] }
 0x6f7   :  { %4327 = vmatprep.subr.bf16.mxu0 %v4670_v0 }
 0x6fa   :  { %4329 = vmatpush3.bf16.msra.mxu0 %v4848_v26 }
 0x6fb   :  { %4330 = vmatprep.subr.bf16.mxu0 %v4670_v0 }
 0x6fc   :  { %v1706_v52 = vpop.f32.mrb[18].mxu1 }
 0x6fd   :  { %v1710_v5 = vadd.f32 %v1706_v52, %v5029_v47  ;;  %v3550_v53 = vpop.f32.mrb[19].mxu1 }
 0x6fe   :  { %4332 = vmatpush3.bf16.msra.mxu0 %v4867_v35 }
 0x6ff   :  { %4490 = vtanh.f32 %v1710_v5  ;;  %4333 = vmatprep.subr.bf16.mxu0 %v4670_v0 }
 0x702   :  { %4335 = vmatpush3.bf16.msra.mxu0 %v4880_v42 }
 0x703   :  { %4336 = vmatprep.subr.bf16.mxu0 %v4670_v0 }
 0x706   :  { %4338 = vmatpush3.bf16.msra.mxu0 %v4891_v48 }
 0x707   :  { %4339 = vmatprep.subr.bf16.mxu0 %v4670_v0 }
 0x709   :  { %v4491_v7 = vpop.eup %4490 }
 0x70a   :  { %4341 = vmatpush3.bf16.msra.mxu0 %v4899_v54  ;;  %3619 = vmatmul.mubr.f32.vlgmr.msra.gmra.mrb[20].mxu1 %v4491_v7  ;;  %v2090_v54 = vld [vmem:[#allocation9 + $0x18] sm:$0xff] }
 0x70b   :  { %4344 = vmatpush3.bf16.msra.mxu1 %v4832_v16  ;;  %4366 = vmatprep.subr.bf16.mxu0 %v4670_v0 }
 0x70c   :  { %4345 = vmatprep.subr.bf16.mxu1 %v4670_v0  ;;  %3688 = vmatprep.mubr.msk.f32.mxu1 %vm4671_vm0, %v4672_v1 }
 0x70d   :  { %3654 = vmatmul.mubr.f32.vlgmr.msra.gmra.mrb[28].mxu0 %v4491_v7 }
 0x70e   :  { %4368 = vmatpush3.bf16.msra.mxu0 %v4913_v60  ;;  %3723 = vmatprep.mubr.msk.f32.mxu0 %vm4671_vm0, %v4672_v1  ;;  %v2087_v1 = vld [vmem:[#allocation9] sm:$0xff] }
 0x70f   :  { %4347 = vmatpush3.bf16.msra.mxu1 %v4837_v21  ;;  %4369 = vmatprep.subr.bf16.mxu0 %v4670_v0  ;;  %v4390_v16 = vpack.c.bf16 %v2088_v15, %v2087_v1  ;;  %v4498_v1 = vld [vmem:[%s5482_s6] ss:$0 sm:$0xff] }
 0x710   :  { %4348 = vmatprep.subr.bf16.mxu1 %v4670_v0 }
 0x712   :  { %4371 = vmatpush3.bf16.msra.mxu0 %v4928_v2  ;;  %v2092_v2 = vld [vmem:[#allocation9 + $0x28] sm:$0xff] }
 0x713   :  { %4350 = vmatpush3.bf16.msra.mxu1 %v4860_v31  ;;  %4372 = vmatprep.subr.bf16.mxu0 %v4670_v0 }
 0x714   :  { %4351 = vmatprep.subr.bf16.mxu1 %v4670_v0 }
 0x716   :  { %4374 = vmatpush3.bf16.msra.mxu0 %v4942_v6 }
 0x717   :  { %4353 = vmatpush3.bf16.msra.mxu1 %v4876_v39  ;;  %4375 = vmatprep.subr.bf16.mxu0 %v4670_v0 }
 0x718   :  { %4354 = vmatprep.subr.bf16.mxu1 %v4670_v0 }
 0x71a   :  { %4377 = vmatpush3.bf16.msra.mxu0 %v4957_v10 }
 0x71b   :  { %4356 = vmatpush3.bf16.msra.mxu1 %v4887_v45  ;;  %4378 = vmatprep.subr.bf16.mxu0 %v4670_v0 }
 0x71c   :  { %4357 = vmatprep.subr.bf16.mxu1 %v4670_v0 }
 0x71e   :  { %4380 = vmatpush3.bf16.msra.mxu0 %v4982_v13  ;;  %v2093_v13 = vld [vmem:[#allocation9 + $0x30] sm:$0xff] }
 0x71f   :  { %4359 = vmatpush3.bf16.msra.mxu1 %v4895_v51  ;;  %4381 = vmatprep.subr.bf16.mxu0 %v4670_v0 }
 0x720   :  { %4360 = vmatprep.subr.bf16.mxu1 %v4670_v0 }
 0x722   :  { %4383 = vmatpush3.bf16.msra.mxu0 %v4992_v18  ;;  %v2094_v18 = vld [vmem:[#allocation9 + $0x38] sm:$0xff] }
 0x723   :  { %4362 = vmatpush3.bf16.msra.mxu1 %v4909_v57  ;;  %4384 = vmatprep.subr.bf16.mxu0 %v4670_v0 }
 0x724   :  { %4363 = vmatprep.subr.bf16.mxu1 %v4670_v0 }
 0x726   :  { %4386 = vmatpush3.bf16.msra.mxu0 %v5002_v22  ;;  %v4402_v22 = vpack.c.bf16 %v2094_v18, %v2093_v13 }
 0x727   :  { %4365 = vmatpush3.bf16.msra.mxu1 %v4923_v63  ;;  %4387 = vmatprep.subr.bf16.mxu0 %v4670_v0  ;;  %v2089_v0 = vld [vmem:[#allocation9 + $0x10] sm:$0xff]  ;;  %v2091_v63 = vld [vmem:[#allocation9 + $0x20] sm:$0xff] }
 0x728   :  { %4391 = vmatprep.subr.bf16.mxu1 %v4390_v16  ;;  %v4394_v57 = vpack.c.bf16 %v2090_v54, %v2089_v0  ;;  %v4398_v10 = vpack.c.bf16 %v2092_v2, %v2091_v63 }
 0x72a   :  { %4389 = vmatpush3.bf16.msra.mxu0 %v5011_v25  ;;  %v2095_v25 = vld [vmem:[#allocation9 + $0x40] sm:$0xff] }
 0x72b   :  { %4423 = vmatprep.subr.bf16.mxu0 %v4422_v12 }
 0x7c0   :  { %v1780_v21 = vpop.f32.mrb[26].mxu0 }
 0x7c1   :  { %v3585_v26 = vpop.f32.mrb[27].mxu0 }
 0x7dd   :  { %v1850_v31 = vpop.f32.mrb[20].mxu1 }
 0x7de   :  { %v1851_v35 = vadd.f32 %v1850_v31, %v1780_v21  ;;  %v3620_v39 = vpop.f32.mrb[21].mxu1  ;;  %v2405_v21 = vld [vmem:[%s5484_s8] ss:$0 sm:$0xff] }
 0x7e0   :  { %v1854_v42 = vadd.f32 %v5070_v59, %v1851_v35  ;;  %v1926_v45 = vpop.f32.mrb[28].mxu0  ;;  %v2097_v59 = vld [vmem:[#allocation9 + $0x50] sm:$0xff] }
 0x7e1   :  { %v1930_v48 = vadd.f32 %v1926_v45, %v5027_v44  ;;  %v3655_v51 = vpop.f32.mrb[29].mxu0  ;;  %v2096_v44 = vld [vmem:[#allocation9 + $0x48] sm:$0xff]  ;;  %v4410_v33 = vpack.c.bf16 %v2098_v56, %v2097_v59 }
 0x7e2   :  { %4492 = vtanh.f32 %v1854_v42  ;;  %v4406_v47 = vpack.c.bf16 %v2096_v44, %v2095_v25 }
 0x7e3   :  { %4494 = vtanh.f32 %v1930_v48 }
 0x7ec   :  { %v4493_v60 = vpop.eup %4492 }
 0x7ed   :  { %v4495_v6 = vpop.eup %4494  ;;  %1858 = vst [vmem:[#allocation12 + $0x30] sm:$0xff] %v4493_v60  ;;  %3689 = vmatmul.mubr.f32.vlgmr.msra.gmra.mrb[22].mxu1 %v4493_v60 }
 0x7ee   :  { %3724 = vmatmul.mubr.f32.vlgmr.msra.gmra.mrb[30].mxu0 %v4495_v6  ;;  %4393 = vmatpush3.bf16.msra.mxu1 %v4390_v16 }
 0x7ef   :  { %3758 = vmatprep.mubr.f32.mxu1 %v5073_v14  ;;  %4395 = vmatprep.subr.bf16.mxu1 %v4394_v57  ;;  %v4414_v14 = vpack.c.bf16 %v2100_v61, %v2099_v58 }
 0x7f0   :  { %4425 = vmatpush3.bf16.msra.mxu0 %v4422_v12 }
 0x7f1   :  { %4427 = vmatprep.subr.bf16.mxu0 %v4426_v19 }
 0x7f2   :  { %4397 = vmatpush3.bf16.msra.mxu1 %v4394_v57 }
 0x7f3   :  { %4399 = vmatprep.subr.bf16.mxu1 %v4398_v10 }
 0x7f4   :  { %4429 = vmatpush3.bf16.msra.mxu0 %v4426_v19 }
 0x7f6   :  { %4401 = vmatpush3.bf16.msra.mxu1 %v4398_v10 }
 0x7f7   :  { %4403 = vmatprep.subr.bf16.mxu1 %v4402_v22 }
 0x7fa   :  { %4405 = vmatpush3.bf16.msra.mxu1 %v4402_v22 }
 0x7fb   :  { %4407 = vmatprep.subr.bf16.mxu1 %v4406_v47 }
 0x7fe   :  { %4409 = vmatpush3.bf16.msra.mxu1 %v4406_v47 }
 0x7ff   :  { %4411 = vmatprep.subr.bf16.mxu1 %v4410_v33 }
 0x802   :  { %4413 = vmatpush3.bf16.msra.mxu1 %v4410_v33  ;;  %v2406_v33 = vld [vmem:[%s5486_s10] ss:$0 sm:$0xff]  ;;  %s2364_s10 = sshll.u32 %s4673_s19, 4  ;;  %s2365_s10 = int_to_ptr.vmem [resolvable:$true] %s2364_s10 }
 0x803   :  { %4415 = vmatprep.subr.bf16.mxu1 %v4414_v14  ;;  %s4609_s21 = scalar_lea.vmem %s2365_s10, 1024  ;;  %p4614_p13 = scmp.lt.s32.totalorder %s2365_s10, %s2365_s10 }
 0x804   :  { %p4610_p12 = scmp.ne.s32.totalorder %s2365_s10, %s4609_s21  ;;  %p4615_p0 = scmp.lt.s32.totalorder %s4609_s21, %s4609_s21 }
 0x806   :  { %4417 = vmatpush3.bf16.msra.mxu1 %v4414_v14  ;;  %p4616_p1 = por %p4615_p0, %p4614_p13 }
 0x807   :  { %4419 = vmatprep.subr.bf16.mxu1 %v4418_v4 }
 0x808   :  { %p4617_p2 = pnand %p4616_p1, %p4610_p12 }
 0x80a   :  { %4421 = vmatpush3.bf16.msra.mxu1 %v4418_v4 }
 0x80d   :  { %3759 = vmatmul.mubr.f32.vlgmr.msra.gmra.mrb[24].mxu1 %v5132_v28  ;;  %v2227_v28 = vld [vmem:[#allocation11 + $0x20] sm:$0xff] }
 0x80e   :  { %3761 = vmatprep.mubr.f32.mxu1 %v5193_v55  ;;  %v4430_v55 = vpack.c.bf16 %v2228_v20, %v2227_v28 }
 0x810   :  { %4431 = vmatprep.subr.bf16.mxu0 %v4430_v55 }
 0x811   :  { %3762 = vmatmul.mubr.f32.gmra.mrb[26].mxu1 %v5252_v8  ;;  %4433 = vmatpush3.bf16.msra.mxu0 %v4430_v55  ;;  %v2229_v8 = vld [vmem:[#allocation11 + $0x30] sm:$0xff] }
 0x812   :  { %3764 = vmatprep.mubr.f32.mxu1 %v5313_v34  ;;  %v4434_v24 = vpack.c.bf16 %v2230_v23, %v2229_v8  ;;  %v2234_v34 = vld [vmem:[#allocation11 + $0x58] sm:$0xff] }
 0x813   :  { %v4442_v36 = vpack.c.bf16 %v2234_v34, %v2233_v32 }
 0x814   :  { %4435 = vmatprep.subr.bf16.mxu0 %v4434_v24 }
 0x815   :  { %3765 = vmatmul.mubr.f32.gmra.mrb[28].mxu1 %v5372_v50  ;;  %4437 = vmatpush3.bf16.msra.mxu0 %v4434_v24 }
 0x816   :  { %3767 = vmatprep.mubr.f32.mxu1 %v4493_v60  ;;  %4439 = vmatprep.subr.bf16.mxu0 %v4438_v30 }
 0x819   :  { %4441 = vmatpush3.bf16.msra.mxu0 %v4438_v30 }
 0x81a   :  { %4443 = vmatprep.subr.bf16.mxu0 %v4442_v36 }
 0x81d   :  { %4445 = vmatpush3.bf16.msra.mxu0 %v4442_v36 }
 0x81e   :  { %4447 = vmatprep.subr.bf16.mxu0 %v4446_v40 }
 0x821   :  { %4449 = vmatpush3.bf16.msra.mxu0 %v4446_v40 }
 0x822   :  { %4451 = vmatprep.subr.bf16.mxu0 %v4450_v49 }
 0x825   :  { %4453 = vmatpush3.bf16.msra.mxu0 %v4450_v49 }
 0x8c0   :  { %v2000_v50 = vpop.f32.mrb[22].mxu1 }
 0x8c1   :  { %v2070_v52 = vpop.f32.mrb[30].mxu0  ;;  %v3690_v5 = vpop.f32.mrb[23].mxu1 }
 0x8c2   :  { %v2071_v53 = vadd.f32 %v2070_v52, %v2000_v50  ;;  %v3725_v7 = vpop.f32.mrb[31].mxu0 }
 0x8c4   :  { %v2074_v15 = vadd.f32 %v4498_v1, %v2071_v53 }
 0x8c6   :  { %4496 = vtanh.f32 %v2074_v15 }
 0x8d0   :  { %v4497_v16 = vpop.eup %4496 }
 0x8d1   :  { %2078 = vst [vmem:[#allocation12 + $0x38] sm:$0xff] %v4497_v16  ;;  %3768 = vmatmul.mubr.f32.gmra.mrb[30].mxu1 %v4497_v16 }
 0x8e0   :  { %v3760_v26 = vpop.f32.mrb[24].mxu1 }
 0x8e1   :  { %v2182_v31 = vadd.f32 %v3760_v26, %v2405_v21  ;;  %v2176_v35 = vpop.f32.mrb[25].mxu1 }
 0x8e2   :  { %v2177_v39 = vadd.f32 %v2405_v21, %v2176_v35 }
 0x8e3   :  { %v2216_v48 = vmax.f32 %v2182_v31, 0.0 }
 0x8e4   :  { %v2215_v42 = vmax.f32 %v2177_v39, 0.0  ;;  %v3763_v45 = vpop.f32.mrb[26].mxu1 }
 0x8e5   :  { %v2192_v51 = vadd.f32 %v3763_v45, %v2405_v21  ;;  %v2186_v0 = vpop.f32.mrb[27].mxu1 }
 0x8e6   :  { %v2187_v54 = vadd.f32 %v2405_v21, %v2186_v0  ;;  %3802 = vmatprep.mubr.f32.mxu0 %v2215_v42 }
 0x8e7   :  { %3803 = vmatmul.mubr.f32.vlgmr.msra.gmra.mrb[32].mxu0 %v2216_v48  ;;  %v2218_v63 = vmax.f32 %v2192_v51, 0.0 }
 0x8e8   :  { %v2217_v57 = vmax.f32 %v2187_v54, 0.0  ;;  %v3766_v60 = vpop.f32.mrb[28].mxu1 }
 0x8e9   :  { %v2202_v2 = vadd.f32 %v3766_v60, %v2405_v21  ;;  %v2196_v6 = vpop.f32.mrb[29].mxu1 }
 0x8ea   :  { %v2197_v10 = vadd.f32 %v2405_v21, %v2196_v6  ;;  %3805 = vmatprep.mubr.f32.mxu0 %v2217_v57 }
 0x8eb   :  { %3806 = vmatmul.mubr.f32.gmra.mrb[34].mxu0 %v2218_v63  ;;  %v2220_v18 = vmax.f32 %v2202_v2, 0.0 }
 0x8ec   :  { %v2219_v13 = vmax.f32 %v2197_v10, 0.0 }
 0x8ee   :  { %3808 = vmatprep.mubr.f32.mxu0 %v2219_v13 }
 0x8ef   :  { %3809 = vmatmul.mubr.f32.gmra.mrb[36].mxu0 %v2220_v18 }
 0x9a4   :  { %v3769_v22 = vpop.f32.mrb[30].mxu1 }
 0x9a5   :  { %v2212_v25 = vadd.f32 %v3769_v22, %v2405_v21  ;;  %v2206_v44 = vpop.f32.mrb[31].mxu1 }
 0x9a6   :  { %v2207_v47 = vadd.f32 %v2405_v21, %v2206_v44 }
 0x9a7   :  { %v2222_v56 = vmax.f32 %v2212_v25, 0.0 }
 0x9a8   :  { %v2221_v59 = vmax.f32 %v2207_v47, 0.0 }
 0x9aa   :  { %3811 = vmatprep.mubr.f32.mxu0 %v2221_v59 }
 0x9ab   :  { %3812 = vmatmul.mubr.f32.gmra.mrb[38].mxu0 %v2222_v56 }
 0x9ba   :  { %v3804_v58 = vpop.f32.mrb[32].mxu0 }
 0x9bb   :  { %v2318_v61 = vadd.f32 %v3804_v58, %v2406_v33  ;;  %v2312_v14 = vpop.f32.mrb[33].mxu0 }
 0x9bc   :  { %v2313_v62 = vadd.f32 %v2406_v33, %v2312_v14 }
 0x9bd   :  { %2352 = vst [vmem:[#allocation13 + $0x8] sm:$0xff] %v2318_v61 }
 0x9be   :  { %2351 = vst [vmem:[#allocation13] sm:$0xff] %v2313_v62  ;;  %v3807_v3 = vpop.f32.mrb[34].mxu0 }
 0x9bf   :  { %v2328_v4 = vadd.f32 %v3807_v3, %v2406_v33  ;;  %v2322_v9 = vpop.f32.mrb[35].mxu0 }
 0x9c0   :  { %v2323_v11 = vadd.f32 %v2406_v33, %v2322_v9 }
 0x9c1   :  { %2354 = vst [vmem:[#allocation13 + $0x18] sm:$0xff] %v2328_v4 }
 0x9c2   :  { %2353 = vst [vmem:[#allocation13 + $0x10] sm:$0xff] %v2323_v11  ;;  %v3810_v12 = vpop.f32.mrb[36].mxu0 }
 0x9c3   :  { %v2338_v17 = vadd.f32 %v3810_v12, %v2406_v33  ;;  %v2332_v41 = vpop.f32.mrb[37].mxu0 }
 0x9c4   :  { %v2333_v19 = vadd.f32 %v2406_v33, %v2332_v41 }
 0x9c5   :  { %2356 = vst [vmem:[#allocation13 + $0x28] sm:$0xff] %v2338_v17 }
 0x9c6   :  { %2355 = vst [vmem:[#allocation13 + $0x20] sm:$0xff] %v2333_v19 }
 0x9c7   :  { %4620 = shalt.err (!%p4617_p2)
}
 0x9c8   :  { %s4621_s7 = scalar_lea.hbm %s5487_s11, 1024 }
 0x9c9   :  { %p4622_p3 = scmp.ne.s32.totalorder %s5487_s11, %s4621_s7  ;;  %p4625_p4 = scmp.lt.u32.totalorder %s4621_s7, %s5487_s11 }
 0x9cb   :  { %p4627_p5 = pnand %p4625_p4, %p4622_p3 }
 0x9cd   :  { %4630 = shalt.err (!%p4627_p5)
}
 0x9ce   :  { %2370 = dma.vmem_to_hbm [thread:$0]  %s2365_s10, 1024, %s5487_s11, [#allocation5], %s4664_s13, %s4664_s13, %s4665_s14  }
 0x9cf   :  { %s4674_s26 = smov [#allocation13]  }
 0x9d0   :  { %s2376_s9 = sshll.u32 %s4674_s26, 4  ;;  %s2377_s9 = int_to_ptr.vmem [resolvable:$true] %s2376_s9 }
 0x9d1   :  { %s4631_s28 = scalar_lea.vmem %s2377_s9, 1024  ;;  %p4636_p7 = scmp.lt.s32.totalorder %s2377_s9, %s2377_s9 }
 0x9d2   :  { %p4632_p6 = scmp.ne.s32.totalorder %s2377_s9, %s4631_s28  ;;  %p4637_p8 = scmp.lt.s32.totalorder %s4631_s28, %s4631_s28 }
 0x9d4   :  { %p4638_p9 = por %p4637_p8, %p4636_p7 }
 0x9d6   :  { %p4639_p10 = pnand %p4638_p9, %p4632_p6 }
 0xa7e   :  { %v3813_v28 = vpop.f32.mrb[38].mxu0 }
 0xa7f   :  { %v2348_v20 = vadd.f32 %v3813_v28, %v2406_v33  ;;  %v2342_v55 = vpop.f32.mrb[39].mxu0 }
 0xa80   :  { %v2343_v8 = vadd.f32 %v2406_v33, %v2342_v55 }
 0xa81   :  { %2358 = vst [vmem:[#allocation13 + $0x38] sm:$0xff] %v2348_v20 }
 0xa82   :  { %2357 = vst [vmem:[#allocation13 + $0x30] sm:$0xff] %v2343_v8 }
 0xa83   :  { %4642 = shalt.err (!%p4639_p10)
}
 0xa84   :  { %s4643_s11 = scalar_lea.hbm %s5488_s12, 1024 }
 0xa85   :  { %p4644_p11 = scmp.ne.s32.totalorder %s5488_s12, %s4643_s11  ;;  %p4647_p12 = scmp.lt.u32.totalorder %s4643_s11, %s5488_s12 }
 0xa87   :  { %p4649_p13 = pnand %p4647_p12, %p4644_p11 }
 0xa89   :  { %4652 = shalt.err (!%p4649_p13)
}
 0xa8a   :  { %2382 = dma.vmem_to_hbm [thread:$0]  %s2377_s9, 1024, %s5488_s12, [#allocation14], %s4664_s13, %s4664_s13, %s4665_s14  }
 0xa8b   :  { %4659 = dma.done.wait [#allocation5], 1024  }
 0xa8c   :  { %4660 = vsyncadd [#allocation5], 4294966272 }
 0xa8d   :  { %4661 = dma.done.wait [#allocation14], 1024  }
 0xa8e   :  { %4662 = vsyncadd [#allocation14], 4294966272 }
 0xa8f   :  { %2389 = vsyncpa [#allocation4], 1 }
 0xa90   :  { %2390 = vsyncpa [#allocation7], 1 }
 0xa91   :  { %2391 = vsyncpa [#allocation10], 1 }
 0xa92   :  { %2392 = vsyncpa [#allocation5], 1 }
 0xa93   :  { %2393 = vsyncpa [#allocation14], 1 }

</bundles_post_ra>
